<compile_context>
chip_gen: v5e
topology: v5e:2x2
jax: 0.10.0
libtpu: 0.0.40
codegen_flags: <defaults>
</compile_context>

<pallas_src>
import math
import functools

import jax
import jax.numpy as jnp
from jax.experimental import pallas as pl
from jax.experimental.pallas import tpu as pltpu

N_LAYERS = 2          # params.transformer_blocks (>=2 so the torch return_attns path is defined)
N_HEAD = 4
D_MODEL = 32
D_KV = 8
NUM_BUCKETS = 32
EPS_LN_LAYER = 1e-12  # T5 LayerNorm inside each attention block
EPS_LN_ENC = 1e-06    # TransformerEncoder-level layer_norm (eps=1e-06 in the reference)


# ----------------------------- Pallas kernel ------------------------------ #
def _t5_layernorm(x, w, eps):
    # T5 style: no mean subtraction, no bias.
    var = jnp.mean(x * x, axis=-1, keepdims=True)
    return (x * jax.lax.rsqrt(var + eps)) * w          # rsqrt -> EUP slot


def encoder_kernel(x_ref, ln_enc_ref, pb_ref,
                   ln_ref, wq_ref, bq_ref, wk_ref, bk_ref, wv_ref, bv_ref,
                   wfc_ref, bfc_ref,
                   out_ref, attn_ref, *, n_layers, n_head, d_kv, batch, seq):
    x = x_ref[...].astype(jnp.float32)                  # (B*L, D)
    d_model = x.shape[-1]

    # Encoder-top layer_norm (+ dropout == identity in eval mode).
    h = _t5_layernorm(x, ln_enc_ref[...], EPS_LN_ENC)

    inv_temp = 1.0 / (float(d_kv) ** 0.5)
    attn_sum = jnp.zeros((batch, seq, seq), jnp.float32)

    for layer in range(n_layers):                        # static layer loop
        ln_w = ln_ref[layer]                             # (1, D)
        wq, wk, wv = wq_ref[layer], wk_ref[layer], wv_ref[layer]   # (D, H*dkv)
        wfc = wfc_ref[layer]                             # (H*dkv, D)

        proj = _t5_layernorm(h, ln_w, EPS_LN_LAYER)      # pre-norm on block input

        q = jnp.dot(proj, wq, preferred_element_type=jnp.float32) + bq_ref[layer]
        k = jnp.dot(proj, wk, preferred_element_type=jnp.float32) + bk_ref[layer]
        v = jnp.dot(proj, wv, preferred_element_type=jnp.float32) + bv_ref[layer]

        # (B*L, H*dkv) -> (B, L, H*dkv): leading-dim split, layout-trivial.
        q3 = q.reshape(batch, seq, n_head * d_kv) * inv_temp
        k3 = k.reshape(batch, seq, n_head * d_kv)
        v3 = v.reshape(batch, seq, n_head * d_kv)

        is_last = layer == n_layers - 1
        mix = jnp.zeros((batch * seq, d_model), jnp.float32)

        for hh in range(n_head):                         # static head loop, no concat
            cols = slice(hh * d_kv, (hh + 1) * d_kv)
            s = jnp.einsum('bqd,bkd->bqk', q3[:, :, cols], k3[:, :, cols],
                           preferred_element_type=jnp.float32)      # (B, L, L)
            s = s + pb_ref[hh][None]                     # relative position bias
            # TODO(synk): optional attention mask (mask is None in this path)

            m = jnp.max(s, axis=-1, keepdims=True)
            e = jnp.exp(s - m)
            a = e * pl.reciprocal(jnp.sum(e, axis=-1, keepdims=True), approx=True)

            if is_last:
                attn_sum = attn_sum + a                  # torch.sum(attn, dim=1), last block

            o_h = jnp.einsum('bqk,bkd->bqd', a, v3[:, :, cols],
                             preferred_element_type=jnp.float32)    # (B, L, dkv)
            # concat(o_h) @ Wfc  ==  sum_h o_h @ Wfc[h*dkv:(h+1)*dkv, :]
            mix = mix + jnp.dot(o_h.reshape(batch * seq, d_kv), wfc[cols, :],
                                preferred_element_type=jnp.float32)

        h = h + mix + bfc_ref[layer]                     # residual (dropout identity)

    # Encoder-bottom layer_norm (same weights as the top one) + dropout identity.
    out = _t5_layernorm(h, ln_enc_ref[...], EPS_LN_ENC)

    out_ref[...] = out.astype(out_ref.dtype)
    attn_ref[...] = attn_sum.astype(attn_ref.dtype)


# ------------------------------ JAX wrapper -------------------------------- #
def transformer_encoder(x, params, position_bias):
    B, L, D = x.shape
    H, dkv, NL = N_HEAD, D_KV, N_LAYERS

    x2 = x.reshape(B * L, D)                 # flatten batch into rows (free)
    pb = position_bias.reshape(H, L, L)      # drop the leading 1

    kern = functools.partial(encoder_kernel, n_layers=NL, n_head=H, d_kv=dkv,
                             batch=B, seq=L)

    args = (x2, params['ln_enc'], pb,
            params['ln_w'], params['wq_t'], params['bq'],
            params['wk_t'], params['bk'], params['wv_t'], params['bv'],
            params['wfc_t'], params['bfc'])

    flops = NL * (2 * B * L * D * 3 * H * dkv            # qkv projections
                  + 2 * 2 * B * H * L * L * dkv          # qk^T and attn@v
                  + 2 * B * L * H * dkv * D)             # output projection
    transcendentals = NL * B * H * L * L + (NL + 2) * B * L
    bytes_accessed = (sum(int(a.size) * a.dtype.itemsize for a in args)
                      + B * L * D * 4 + B * L * L * 4)

    vmem = pl.BlockSpec(memory_space=pltpu.MemorySpace.VMEM)
    out2, attn = pl.pallas_call(
        kern,
        out_shape=(jax.ShapeDtypeStruct((B * L, D), x.dtype),
                   jax.ShapeDtypeStruct((B, L, L), jnp.float32)),
        in_specs=[vmem] * len(args),
        out_specs=(vmem, vmem),
        cost_estimate=pl.CostEstimate(flops=flops,
                                      transcendentals=transcendentals,
                                      bytes_accessed=bytes_accessed),
    )(*args)
    return out2.reshape(B, L, D), attn


# ------------------ relative position bias (plain-JAX glue) ---------------- #
def relative_position_bucket(relative_position, bidirectional=True,
                             num_buckets=32, max_distance=128):
    ret = jnp.zeros_like(relative_position)
    n = -relative_position
    if bidirectional:
        num_buckets //= 2
        ret = ret + (n < 0).astype(relative_position.dtype) * num_buckets
        n = jnp.abs(n)
    else:
        n = jnp.maximum(n, jnp.zeros_like(n))
    max_exact = num_buckets // 2
    is_small = n < max_exact
    val_if_large = max_exact + (
        jnp.log(n.astype(jnp.float32) / max_exact)
        / math.log(max_distance / max_exact)
        * (num_buckets - max_exact)
    ).astype(relative_position.dtype)
    val_if_large = jnp.minimum(val_if_large,
                               jnp.full_like(val_if_large, num_buckets - 1))
    ret = ret + jnp.where(is_small, n, val_if_large)
    return ret


def compute_bias(context_position, memory_position, emb_weight):
    # context_position / memory_position: (1, L) int32
    relative_position = memory_position[:, None, :] - context_position[:, :, None]
    rp_bucket = relative_position_bucket(relative_position,
                                         bidirectional=True,
                                         num_buckets=NUM_BUCKETS)
    values = emb_weight[rp_bucket]                       # (1, Lq, Lkv, H)
    values = jnp.transpose(values, (0, 3, 1, 2))         # (1, H, Lq, Lkv)
    return values


# --------------------------------- main ------------------------------------ #
if __name__ == "__main__":
    B, L = 2, 8
    d_model, n_head, d_kv, n_layers = D_MODEL, N_HEAD, D_KV, N_LAYERS

    key = jax.random.PRNGKey(0)
    ks = jax.random.split(key, 12)

    def stack(k, shape, scale):
        return jax.random.normal(k, (n_layers,) + shape, jnp.float32) * scale

    # Per-block MHA parameters, stacked on a leading layer axis.  Linear
    # weights are pre-transposed to (in, out) so the kernel computes x @ W + b.
    params = {
        'wq_t': stack(ks[0], (d_model, n_head * d_kv), (d_model * d_kv) ** (-0.5)),
        'wk_t': stack(ks[1], (d_model, n_head * d_kv), d_model ** (-0.5)),
        'wv_t': stack(ks[2], (d_model, n_head * d_kv), d_model ** (-0.5)),
        'wfc_t': stack(ks[3], (n_head * d_kv, d_model), (n_head * d_kv) ** (-0.5)),
        'bq': stack(ks[4], (1, n_head * d_kv), 0.02),
        'bk': stack(ks[5], (1, n_head * d_kv), 0.02),
        'bv': stack(ks[6], (1, n_head * d_kv), 0.02),
        'bfc': stack(ks[7], (1, d_model), 0.02),
        'ln_w': jnp.ones((n_layers, 1, d_model), jnp.float32),   # per-block T5 LN weight
        'ln_enc': jnp.ones((1, d_model), jnp.float32),           # encoder top/bottom LN (shared)
    }
    # Layer 0's relative_attention_bias: nn.Embedding(num_buckets, n_heads), N(0, 1).
    rel_emb = jax.random.normal(ks[8], (NUM_BUCKETS, n_head), jnp.float32)

    # Inputs
    x = jax.random.normal(ks[9], (B, L, d_model), jnp.float32)
    context_position = jnp.arange(L, dtype=jnp.int32)[None, :]
    memory_position = jnp.arange(L, dtype=jnp.int32)[None, :]
    position_bias = compute_bias(context_position, memory_position, rel_emb)  # (1,H,L,L)

    out, attn = transformer_encoder(x, params, position_bias)
    jax.block_until_ready((out, attn))

    assert out.shape == (B, L, d_model)
    assert attn.shape == (B, L, L)
    print("KERNEL_OK")
</pallas_src>

<mosaic_0001>
module attributes {stable_mosaic.version = 11 : i64} {
  func.func @encoder_kernel(%arg0: memref<16x32xf32, #tpu.memory_space<vmem>>, %arg1: memref<1x32xf32, #tpu.memory_space<vmem>>, %arg2: memref<4x8x8xf32, #tpu.memory_space<vmem>>, %arg3: memref<2x1x32xf32, #tpu.memory_space<vmem>>, %arg4: memref<2x32x32xf32, #tpu.memory_space<vmem>>, %arg5: memref<2x1x32xf32, #tpu.memory_space<vmem>>, %arg6: memref<2x32x32xf32, #tpu.memory_space<vmem>>, %arg7: memref<2x1x32xf32, #tpu.memory_space<vmem>>, %arg8: memref<2x32x32xf32, #tpu.memory_space<vmem>>, %arg9: memref<2x1x32xf32, #tpu.memory_space<vmem>>, %arg10: memref<2x32x32xf32, #tpu.memory_space<vmem>>, %arg11: memref<2x1x32xf32, #tpu.memory_space<vmem>>, %arg12: memref<16x32xf32, #tpu.memory_space<vmem>>, %arg13: memref<2x8x8xf32, #tpu.memory_space<vmem>>) attributes {dimension_semantics = [], scalar_prefetch = 0 : i64, scratch_operands = 0 : i64, tpu.core_type = #tpu.core_type<tc>} {
    %c0 = arith.constant 0 : index
    %c0_0 = arith.constant 0 : index
    %0 = vector.load %arg0[%c0, %c0_0] : memref<16x32xf32, #tpu.memory_space<vmem>>, vector<16x32xf32>
    %c0_1 = arith.constant 0 : index
    %c0_2 = arith.constant 0 : index
    %1 = vector.load %arg1[%c0_1, %c0_2] : memref<1x32xf32, #tpu.memory_space<vmem>>, vector<1x32xf32>
    %2 = arith.mulf %0, %0 : vector<16x32xf32>
    %cst = arith.constant dense<0.000000e+00> : vector<16xf32>
    %3 = vector.multi_reduction <add>, %2, %cst [1] : vector<16x32xf32> to vector<16xf32>
    %4 = vector.shape_cast %3 : vector<16xf32> to vector<16x1xf32>
    %cst_3 = arith.constant 3.200000e+01 : f32
    %5 = vector.broadcast %cst_3 : f32 to vector<16x1xf32>
    %6 = arith.divf %4, %5 : vector<16x1xf32>
    %cst_4 = arith.constant 9.99999997E-7 : f32
    %7 = vector.broadcast %cst_4 : f32 to vector<16x1xf32>
    %8 = arith.addf %6, %7 : vector<16x1xf32>
    %9 = math.rsqrt %8 : vector<16x1xf32>
    %10 = vector.broadcast %9 : vector<16x1xf32> to vector<16x32xf32>
    %11 = arith.mulf %0, %10 : vector<16x32xf32>
    %12 = vector.broadcast %1 : vector<1x32xf32> to vector<16x32xf32>
    %13 = arith.mulf %11, %12 : vector<16x32xf32>
    %cst_5 = arith.constant 0.000000e+00 : f32
    %14 = vector.broadcast %cst_5 : f32 to vector<2x8x8xf32>
    %c0_6 = arith.constant 0 : index
    %c0_7 = arith.constant 0 : index
    %c0_8 = arith.constant 0 : index
    %15 = vector.load %arg3[%c0_6, %c0_7, %c0_8] : memref<2x1x32xf32, #tpu.memory_space<vmem>>, vector<1x1x32xf32>
    %16 = vector.shape_cast %15 : vector<1x1x32xf32> to vector<1x32xf32>
    %c0_9 = arith.constant 0 : index
    %c0_10 = arith.constant 0 : index
    %c0_11 = arith.constant 0 : index
    %17 = vector.load %arg4[%c0_9, %c0_10, %c0_11] : memref<2x32x32xf32, #tpu.memory_space<vmem>>, vector<1x32x32xf32>
    %18 = vector.shape_cast %17 : vector<1x32x32xf32> to vector<32x32xf32>
    %c0_12 = arith.constant 0 : index
    %c0_13 = arith.constant 0 : index
    %c0_14 = arith.constant 0 : index
    %19 = vector.load %arg6[%c0_12, %c0_13, %c0_14] : memref<2x32x32xf32, #tpu.memory_space<vmem>>, vector<1x32x32xf32>
    %20 = vector.shape_cast %19 : vector<1x32x32xf32> to vector<32x32xf32>
    %c0_15 = arith.constant 0 : index
    %c0_16 = arith.constant 0 : index
    %c0_17 = arith.constant 0 : index
    %21 = vector.load %arg8[%c0_15, %c0_16, %c0_17] : memref<2x32x32xf32, #tpu.memory_space<vmem>>, vector<1x32x32xf32>
    %22 = vector.shape_cast %21 : vector<1x32x32xf32> to vector<32x32xf32>
    %c0_18 = arith.constant 0 : index
    %c0_19 = arith.constant 0 : index
    %c0_20 = arith.constant 0 : index
    %23 = vector.load %arg10[%c0_18, %c0_19, %c0_20] : memref<2x32x32xf32, #tpu.memory_space<vmem>>, vector<1x32x32xf32>
    %24 = vector.shape_cast %23 : vector<1x32x32xf32> to vector<32x32xf32>
    %25 = arith.mulf %13, %13 : vector<16x32xf32>
    %cst_21 = arith.constant dense<0.000000e+00> : vector<16xf32>
    %26 = vector.multi_reduction <add>, %25, %cst_21 [1] : vector<16x32xf32> to vector<16xf32>
    %27 = vector.shape_cast %26 : vector<16xf32> to vector<16x1xf32>
    %cst_22 = arith.constant 3.200000e+01 : f32
    %28 = vector.broadcast %cst_22 : f32 to vector<16x1xf32>
    %29 = arith.divf %27, %28 : vector<16x1xf32>
    %cst_23 = arith.constant 9.99999996E-13 : f32
    %30 = vector.broadcast %cst_23 : f32 to vector<16x1xf32>
    %31 = arith.addf %29, %30 : vector<16x1xf32>
    %32 = math.rsqrt %31 : vector<16x1xf32>
    %33 = vector.broadcast %32 : vector<16x1xf32> to vector<16x32xf32>
    %34 = arith.mulf %13, %33 : vector<16x32xf32>
    %35 = vector.broadcast %16 : vector<1x32xf32> to vector<16x32xf32>
    %36 = arith.mulf %34, %35 : vector<16x32xf32>
    %cst_24 = arith.constant dense<0.000000e+00> : vector<16x32xf32>
    %37 = tpu.matmul %36, %18, %cst_24 {dimension_numbers = #tpu.dot_dimension_numbers<[1], [0], [0], [1], [0, 0, 1, 1], [], []>} : vector<16x32xf32>, vector<32x32xf32>, vector<16x32xf32> -> vector<16x32xf32>
    %c0_25 = arith.constant 0 : index
    %c0_26 = arith.constant 0 : index
    %c0_27 = arith.constant 0 : index
    %38 = vector.load %arg5[%c0_25, %c0_26, %c0_27] : memref<2x1x32xf32, #tpu.memory_space<vmem>>, vector<1x1x32xf32>
    %39 = vector.shape_cast %38 : vector<1x1x32xf32> to vector<1x32xf32>
    %40 = vector.broadcast %39 : vector<1x32xf32> to vector<16x32xf32>
    %41 = arith.addf %37, %40 : vector<16x32xf32>
    %cst_28 = arith.constant dense<0.000000e+00> : vector<16x32xf32>
    %42 = tpu.matmul %36, %20, %cst_28 {dimension_numbers = #tpu.dot_dimension_numbers<[1], [0], [0], [1], [0, 0, 1, 1], [], []>} : vector<16x32xf32>, vector<32x32xf32>, vector<16x32xf32> -> vector<16x32xf32>
    %c0_29 = arith.constant 0 : index
    %c0_30 = arith.constant 0 : index
    %c0_31 = arith.constant 0 : index
    %43 = vector.load %arg7[%c0_29, %c0_30, %c0_31] : memref<2x1x32xf32, #tpu.memory_space<vmem>>, vector<1x1x32xf32>
    %44 = vector.shape_cast %43 : vector<1x1x32xf32> to vector<1x32xf32>
    %45 = vector.broadcast %44 : vector<1x32xf32> to vector<16x32xf32>
    %46 = arith.addf %42, %45 : vector<16x32xf32>
    %cst_32 = arith.constant dense<0.000000e+00> : vector<16x32xf32>
    %47 = tpu.matmul %36, %22, %cst_32 {dimension_numbers = #tpu.dot_dimension_numbers<[1], [0], [0], [1], [0, 0, 1, 1], [], []>} : vector<16x32xf32>, vector<32x32xf32>, vector<16x32xf32> -> vector<16x32xf32>
    %c0_33 = arith.constant 0 : index
    %c0_34 = arith.constant 0 : index
    %c0_35 = arith.constant 0 : index
    %48 = vector.load %arg9[%c0_33, %c0_34, %c0_35] : memref<2x1x32xf32, #tpu.memory_space<vmem>>, vector<1x1x32xf32>
    %49 = vector.shape_cast %48 : vector<1x1x32xf32> to vector<1x32xf32>
    %50 = vector.broadcast %49 : vector<1x32xf32> to vector<16x32xf32>
    %51 = arith.addf %47, %50 : vector<16x32xf32>
    %52 = vector.shape_cast %41 : vector<16x32xf32> to vector<2x8x32xf32>
    %cst_36 = arith.constant 0.353553385 : f32
    %53 = vector.broadcast %cst_36 : f32 to vector<2x8x32xf32>
    %54 = arith.mulf %52, %53 : vector<2x8x32xf32>
    %55 = vector.shape_cast %46 : vector<16x32xf32> to vector<2x8x32xf32>
    %56 = vector.shape_cast %51 : vector<16x32xf32> to vector<2x8x32xf32>
    %cst_37 = arith.constant 0.000000e+00 : f32
    %57 = vector.broadcast %cst_37 : f32 to vector<16x32xf32>
    %58 = vector.extract_strided_slice %54 {offsets = [0, 0, 0], sizes = [2, 8, 8], strides = [1, 1, 1]} : vector<2x8x32xf32> to vector<2x8x8xf32>
    %59 = vector.extract_strided_slice %55 {offsets = [0, 0, 0], sizes = [2, 8, 8], strides = [1, 1, 1]} : vector<2x8x32xf32> to vector<2x8x8xf32>
    "tpu.trace_start"() <{level = 10 : i32, message = "bqd,bkd->bqk"}> : () -> ()
    %cst_38 = arith.constant dense<0.000000e+00> : vector<2x8x8xf32>
    %60 = tpu.matmul %58, %59, %cst_38 {dimension_numbers = #tpu.dot_dimension_numbers<[2], [2], [1], [1], [0, 0, 0, 1, 1, 1], [0], [0]>} : vector<2x8x8xf32>, vector<2x8x8xf32>, vector<2x8x8xf32> -> vector<2x8x8xf32>
    "tpu.trace_stop"() : () -> ()
    %c0_39 = arith.constant 0 : index
    %c0_40 = arith.constant 0 : index
    %c0_41 = arith.constant 0 : index
    %61 = vector.load %arg2[%c0_39, %c0_40, %c0_41] : memref<4x8x8xf32, #tpu.memory_space<vmem>>, vector<1x8x8xf32>
    %62 = vector.shape_cast %61 : vector<1x8x8xf32> to vector<8x8xf32>
    %63 = vector.shape_cast %62 : vector<8x8xf32> to vector<1x8x8xf32>
    %64 = vector.broadcast %63 : vector<1x8x8xf32> to vector<2x8x8xf32>
    %65 = arith.addf %60, %64 : vector<2x8x8xf32>
    %cst_42 = arith.constant dense<0xFF800000> : vector<2x8xf32>
    %66 = vector.multi_reduction <maximumf>, %65, %cst_42 [2] : vector<2x8x8xf32> to vector<2x8xf32>
    %67 = vector.shape_cast %66 : vector<2x8xf32> to vector<2x8x1xf32>
    %68 = vector.broadcast %67 : vector<2x8x1xf32> to vector<2x8x8xf32>
    %69 = arith.subf %65, %68 : vector<2x8x8xf32>
    %70 = math.exp %69 : vector<2x8x8xf32>
    %cst_43 = arith.constant dense<0.000000e+00> : vector<2x8xf32>
    %71 = vector.multi_reduction <add>, %70, %cst_43 [2] : vector<2x8x8xf32> to vector<2x8xf32>
    %72 = vector.shape_cast %71 : vector<2x8xf32> to vector<2x8x1xf32>
    %73 = tpu.reciprocal %72 {approx = true} : vector<2x8x1xf32> -> vector<2x8x1xf32>
    %74 = vector.broadcast %73 : vector<2x8x1xf32> to vector<2x8x8xf32>
    %75 = arith.mulf %70, %74 : vector<2x8x8xf32>
    %76 = vector.extract_strided_slice %56 {offsets = [0, 0, 0], sizes = [2, 8, 8], strides = [1, 1, 1]} : vector<2x8x32xf32> to vector<2x8x8xf32>
    "tpu.trace_start"() <{level = 10 : i32, message = "bqk,bkd->bqd"}> : () -> ()
    %cst_44 = arith.constant dense<0.000000e+00> : vector<2x8x8xf32>
    %77 = tpu.matmul %75, %76, %cst_44 {dimension_numbers = #tpu.dot_dimension_numbers<[2], [1], [1], [2], [0, 0, 0, 1, 1, 2], [0], [0]>} : vector<2x8x8xf32>, vector<2x8x8xf32>, vector<2x8x8xf32> -> vector<2x8x8xf32>
    "tpu.trace_stop"() : () -> ()
    %78 = vector.shape_cast %77 : vector<2x8x8xf32> to vector<16x8xf32>
    %79 = vector.extract_strided_slice %24 {offsets = [0, 0], sizes = [8, 32], strides = [1, 1]} : vector<32x32xf32> to vector<8x32xf32>
    %cst_45 = arith.constant dense<0.000000e+00> : vector<16x32xf32>
    %80 = tpu.matmul %78, %79, %cst_45 {dimension_numbers = #tpu.dot_dimension_numbers<[1], [0], [0], [1], [0, 0, 1, 1], [], []>} : vector<16x8xf32>, vector<8x32xf32>, vector<16x32xf32> -> vector<16x32xf32>
    %81 = arith.addf %57, %80 : vector<16x32xf32>
    %82 = vector.extract_strided_slice %54 {offsets = [0, 0, 8], sizes = [2, 8, 8], strides = [1, 1, 1]} : vector<2x8x32xf32> to vector<2x8x8xf32>
    %83 = vector.extract_strided_slice %55 {offsets = [0, 0, 8], sizes = [2, 8, 8], strides = [1, 1, 1]} : vector<2x8x32xf32> to vector<2x8x8xf32>
    "tpu.trace_start"() <{level = 10 : i32, message = "bqd,bkd->bqk"}> : () -> ()
    %cst_46 = arith.constant dense<0.000000e+00> : vector<2x8x8xf32>
    %84 = tpu.matmul %82, %83, %cst_46 {dimension_numbers = #tpu.dot_dimension_numbers<[2], [2], [1], [1], [0, 0, 0, 1, 1, 1], [0], [0]>} : vector<2x8x8xf32>, vector<2x8x8xf32>, vector<2x8x8xf32> -> vector<2x8x8xf32>
    "tpu.trace_stop"() : () -> ()
    %c1 = arith.constant 1 : index
    %c0_47 = arith.constant 0 : index
    %c0_48 = arith.constant 0 : index
    %85 = vector.load %arg2[%c1, %c0_47, %c0_48] : memref<4x8x8xf32, #tpu.memory_space<vmem>>, vector<1x8x8xf32>
    %86 = vector.shape_cast %85 : vector<1x8x8xf32> to vector<8x8xf32>
    %87 = vector.shape_cast %86 : vector<8x8xf32> to vector<1x8x8xf32>
    %88 = vector.broadcast %87 : vector<1x8x8xf32> to vector<2x8x8xf32>
    %89 = arith.addf %84, %88 : vector<2x8x8xf32>
    %cst_49 = arith.constant dense<0xFF800000> : vector<2x8xf32>
    %90 = vector.multi_reduction <maximumf>, %89, %cst_49 [2] : vector<2x8x8xf32> to vector<2x8xf32>
    %91 = vector.shape_cast %90 : vector<2x8xf32> to vector<2x8x1xf32>
    %92 = vector.broadcast %91 : vector<2x8x1xf32> to vector<2x8x8xf32>
    %93 = arith.subf %89, %92 : vector<2x8x8xf32>
    %94 = math.exp %93 : vector<2x8x8xf32>
    %cst_50 = arith.constant dense<0.000000e+00> : vector<2x8xf32>
    %95 = vector.multi_reduction <add>, %94, %cst_50 [2] : vector<2x8x8xf32> to vector<2x8xf32>
    %96 = vector.shape_cast %95 : vector<2x8xf32> to vector<2x8x1xf32>
    %97 = tpu.reciprocal %96 {approx = true} : vector<2x8x1xf32> -> vector<2x8x1xf32>
    %98 = vector.broadcast %97 : vector<2x8x1xf32> to vector<2x8x8xf32>
    %99 = arith.mulf %94, %98 : vector<2x8x8xf32>
    %100 = vector.extract_strided_slice %56 {offsets = [0, 0, 8], sizes = [2, 8, 8], strides = [1, 1, 1]} : vector<2x8x32xf32> to vector<2x8x8xf32>
    "tpu.trace_start"() <{level = 10 : i32, message = "bqk,bkd->bqd"}> : () -> ()
    %cst_51 = arith.constant dense<0.000000e+00> : vector<2x8x8xf32>
    %101 = tpu.matmul %99, %100, %cst_51 {dimension_numbers = #tpu.dot_dimension_numbers<[2], [1], [1], [2], [0, 0, 0, 1, 1, 2], [0], [0]>} : vector<2x8x8xf32>, vector<2x8x8xf32>, vector<2x8x8xf32> -> vector<2x8x8xf32>
    "tpu.trace_stop"() : () -> ()
    %102 = vector.shape_cast %101 : vector<2x8x8xf32> to vector<16x8xf32>
    %103 = vector.extract_strided_slice %24 {offsets = [8, 0], sizes = [8, 32], strides = [1, 1]} : vector<32x32xf32> to vector<8x32xf32>
    %cst_52 = arith.constant dense<0.000000e+00> : vector<16x32xf32>
    %104 = tpu.matmul %102, %103, %cst_52 {dimension_numbers = #tpu.dot_dimension_numbers<[1], [0], [0], [1], [0, 0, 1, 1], [], []>} : vector<16x8xf32>, vector<8x32xf32>, vector<16x32xf32> -> vector<16x32xf32>
    %105 = arith.addf %81, %104 : vector<16x32xf32>
    %106 = vector.extract_strided_slice %54 {offsets = [0, 0, 16], sizes = [2, 8, 8], strides = [1, 1, 1]} : vector<2x8x32xf32> to vector<2x8x8xf32>
    %107 = vector.extract_strided_slice %55 {offsets = [0, 0, 16], sizes = [2, 8, 8], strides = [1, 1, 1]} : vector<2x8x32xf32> to vector<2x8x8xf32>
    "tpu.trace_start"() <{level = 10 : i32, message = "bqd,bkd->bqk"}> : () -> ()
    %cst_53 = arith.constant dense<0.000000e+00> : vector<2x8x8xf32>
    %108 = tpu.matmul %106, %107, %cst_53 {dimension_numbers = #tpu.dot_dimension_numbers<[2], [2], [1], [1], [0, 0, 0, 1, 1, 1], [0], [0]>} : vector<2x8x8xf32>, vector<2x8x8xf32>, vector<2x8x8xf32> -> vector<2x8x8xf32>
    "tpu.trace_stop"() : () -> ()
    %c2 = arith.constant 2 : index
    %c0_54 = arith.constant 0 : index
    %c0_55 = arith.constant 0 : index
    %109 = vector.load %arg2[%c2, %c0_54, %c0_55] : memref<4x8x8xf32, #tpu.memory_space<vmem>>, vector<1x8x8xf32>
    %110 = vector.shape_cast %109 : vector<1x8x8xf32> to vector<8x8xf32>
    %111 = vector.shape_cast %110 : vector<8x8xf32> to vector<1x8x8xf32>
    %112 = vector.broadcast %111 : vector<1x8x8xf32> to vector<2x8x8xf32>
    %113 = arith.addf %108, %112 : vector<2x8x8xf32>
    %cst_56 = arith.constant dense<0xFF800000> : vector<2x8xf32>
    %114 = vector.multi_reduction <maximumf>, %113, %cst_56 [2] : vector<2x8x8xf32> to vector<2x8xf32>
    %115 = vector.shape_cast %114 : vector<2x8xf32> to vector<2x8x1xf32>
    %116 = vector.broadcast %115 : vector<2x8x1xf32> to vector<2x8x8xf32>
    %117 = arith.subf %113, %116 : vector<2x8x8xf32>
    %118 = math.exp %117 : vector<2x8x8xf32>
    %cst_57 = arith.constant dense<0.000000e+00> : vector<2x8xf32>
    %119 = vector.multi_reduction <add>, %118, %cst_57 [2] : vector<2x8x8xf32> to vector<2x8xf32>
    %120 = vector.shape_cast %119 : vector<2x8xf32> to vector<2x8x1xf32>
    %121 = tpu.reciprocal %120 {approx = true} : vector<2x8x1xf32> -> vector<2x8x1xf32>
    %122 = vector.broadcast %121 : vector<2x8x1xf32> to vector<2x8x8xf32>
    %123 = arith.mulf %118, %122 : vector<2x8x8xf32>
    %124 = vector.extract_strided_slice %56 {offsets = [0, 0, 16], sizes = [2, 8, 8], strides = [1, 1, 1]} : vector<2x8x32xf32> to vector<2x8x8xf32>
    "tpu.trace_start"() <{level = 10 : i32, message = "bqk,bkd->bqd"}> : () -> ()
    %cst_58 = arith.constant dense<0.000000e+00> : vector<2x8x8xf32>
    %125 = tpu.matmul %123, %124, %cst_58 {dimension_numbers = #tpu.dot_dimension_numbers<[2], [1], [1], [2], [0, 0, 0, 1, 1, 2], [0], [0]>} : vector<2x8x8xf32>, vector<2x8x8xf32>, vector<2x8x8xf32> -> vector<2x8x8xf32>
    "tpu.trace_stop"() : () -> ()
    %126 = vector.shape_cast %125 : vector<2x8x8xf32> to vector<16x8xf32>
    %127 = vector.extract_strided_slice %24 {offsets = [16, 0], sizes = [8, 32], strides = [1, 1]} : vector<32x32xf32> to vector<8x32xf32>
    %cst_59 = arith.constant dense<0.000000e+00> : vector<16x32xf32>
    %128 = tpu.matmul %126, %127, %cst_59 {dimension_numbers = #tpu.dot_dimension_numbers<[1], [0], [0], [1], [0, 0, 1, 1], [], []>} : vector<16x8xf32>, vector<8x32xf32>, vector<16x32xf32> -> vector<16x32xf32>
    %129 = arith.addf %105, %128 : vector<16x32xf32>
    %130 = vector.extract_strided_slice %54 {offsets = [0, 0, 24], sizes = [2, 8, 8], strides = [1, 1, 1]} : vector<2x8x32xf32> to vector<2x8x8xf32>
    %131 = vector.extract_strided_slice %55 {offsets = [0, 0, 24], sizes = [2, 8, 8], strides = [1, 1, 1]} : vector<2x8x32xf32> to vector<2x8x8xf32>
    "tpu.trace_start"() <{level = 10 : i32, message = "bqd,bkd->bqk"}> : () -> ()
    %cst_60 = arith.constant dense<0.000000e+00> : vector<2x8x8xf32>
    %132 = tpu.matmul %130, %131, %cst_60 {dimension_numbers = #tpu.dot_dimension_numbers<[2], [2], [1], [1], [0, 0, 0, 1, 1, 1], [0], [0]>} : vector<2x8x8xf32>, vector<2x8x8xf32>, vector<2x8x8xf32> -> vector<2x8x8xf32>
    "tpu.trace_stop"() : () -> ()
    %c3 = arith.constant 3 : index
    %c0_61 = arith.constant 0 : index
    %c0_62 = arith.constant 0 : index
    %133 = vector.load %arg2[%c3, %c0_61, %c0_62] : memref<4x8x8xf32, #tpu.memory_space<vmem>>, vector<1x8x8xf32>
    %134 = vector.shape_cast %133 : vector<1x8x8xf32> to vector<8x8xf32>
    %135 = vector.shape_cast %134 : vector<8x8xf32> to vector<1x8x8xf32>
    %136 = vector.broadcast %135 : vector<1x8x8xf32> to vector<2x8x8xf32>
    %137 = arith.addf %132, %136 : vector<2x8x8xf32>
    %cst_63 = arith.constant dense<0xFF800000> : vector<2x8xf32>
    %138 = vector.multi_reduction <maximumf>, %137, %cst_63 [2] : vector<2x8x8xf32> to vector<2x8xf32>
    %139 = vector.shape_cast %138 : vector<2x8xf32> to vector<2x8x1xf32>
    %140 = vector.broadcast %139 : vector<2x8x1xf32> to vector<2x8x8xf32>
    %141 = arith.subf %137, %140 : vector<2x8x8xf32>
    %142 = math.exp %141 : vector<2x8x8xf32>
    %cst_64 = arith.constant dense<0.000000e+00> : vector<2x8xf32>
    %143 = vector.multi_reduction <add>, %142, %cst_64 [2] : vector<2x8x8xf32> to vector<2x8xf32>
    %144 = vector.shape_cast %143 : vector<2x8xf32> to vector<2x8x1xf32>
    %145 = tpu.reciprocal %144 {approx = true} : vector<2x8x1xf32> -> vector<2x8x1xf32>
    %146 = vector.broadcast %145 : vector<2x8x1xf32> to vector<2x8x8xf32>
    %147 = arith.mulf %142, %146 : vector<2x8x8xf32>
    %148 = vector.extract_strided_slice %56 {offsets = [0, 0, 24], sizes = [2, 8, 8], strides = [1, 1, 1]} : vector<2x8x32xf32> to vector<2x8x8xf32>
    "tpu.trace_start"() <{level = 10 : i32, message = "bqk,bkd->bqd"}> : () -> ()
    %cst_65 = arith.constant dense<0.000000e+00> : vector<2x8x8xf32>
    %149 = tpu.matmul %147, %148, %cst_65 {dimension_numbers = #tpu.dot_dimension_numbers<[2], [1], [1], [2], [0, 0, 0, 1, 1, 2], [0], [0]>} : vector<2x8x8xf32>, vector<2x8x8xf32>, vector<2x8x8xf32> -> vector<2x8x8xf32>
    "tpu.trace_stop"() : () -> ()
    %150 = vector.shape_cast %149 : vector<2x8x8xf32> to vector<16x8xf32>
    %151 = vector.extract_strided_slice %24 {offsets = [24, 0], sizes = [8, 32], strides = [1, 1]} : vector<32x32xf32> to vector<8x32xf32>
    %cst_66 = arith.constant dense<0.000000e+00> : vector<16x32xf32>
    %152 = tpu.matmul %150, %151, %cst_66 {dimension_numbers = #tpu.dot_dimension_numbers<[1], [0], [0], [1], [0, 0, 1, 1], [], []>} : vector<16x8xf32>, vector<8x32xf32>, vector<16x32xf32> -> vector<16x32xf32>
    %153 = arith.addf %129, %152 : vector<16x32xf32>
    %154 = arith.addf %13, %153 : vector<16x32xf32>
    %c0_67 = arith.constant 0 : index
    %c0_68 = arith.constant 0 : index
    %c0_69 = arith.constant 0 : index
    %155 = vector.load %arg11[%c0_67, %c0_68, %c0_69] : memref<2x1x32xf32, #tpu.memory_space<vmem>>, vector<1x1x32xf32>
    %156 = vector.shape_cast %155 : vector<1x1x32xf32> to vector<1x32xf32>
    %157 = vector.broadcast %156 : vector<1x32xf32> to vector<16x32xf32>
    %158 = arith.addf %154, %157 : vector<16x32xf32>
    %c1_70 = arith.constant 1 : index
    %c0_71 = arith.constant 0 : index
    %c0_72 = arith.constant 0 : index
    %159 = vector.load %arg3[%c1_70, %c0_71, %c0_72] : memref<2x1x32xf32, #tpu.memory_space<vmem>>, vector<1x1x32xf32>
    %160 = vector.shape_cast %159 : vector<1x1x32xf32> to vector<1x32xf32>
    %c1_73 = arith.constant 1 : index
    %c0_74 = arith.constant 0 : index
    %c0_75 = arith.constant 0 : index
    %161 = vector.load %arg4[%c1_73, %c0_74, %c0_75] : memref<2x32x32xf32, #tpu.memory_space<vmem>>, vector<1x32x32xf32>
    %162 = vector.shape_cast %161 : vector<1x32x32xf32> to vector<32x32xf32>
    %c1_76 = arith.constant 1 : index
    %c0_77 = arith.constant 0 : index
    %c0_78 = arith.constant 0 : index
    %163 = vector.load %arg6[%c1_76, %c0_77, %c0_78] : memref<2x32x32xf32, #tpu.memory_space<vmem>>, vector<1x32x32xf32>
    %164 = vector.shape_cast %163 : vector<1x32x32xf32> to vector<32x32xf32>
    %c1_79 = arith.constant 1 : index
    %c0_80 = arith.constant 0 : index
    %c0_81 = arith.constant 0 : index
    %165 = vector.load %arg8[%c1_79, %c0_80, %c0_81] : memref<2x32x32xf32, #tpu.memory_space<vmem>>, vector<1x32x32xf32>
    %166 = vector.shape_cast %165 : vector<1x32x32xf32> to vector<32x32xf32>
    %c1_82 = arith.constant 1 : index
    %c0_83 = arith.constant 0 : index
    %c0_84 = arith.constant 0 : index
    %167 = vector.load %arg10[%c1_82, %c0_83, %c0_84] : memref<2x32x32xf32, #tpu.memory_space<vmem>>, vector<1x32x32xf32>
    %168 = vector.shape_cast %167 : vector<1x32x32xf32> to vector<32x32xf32>
    %169 = arith.mulf %158, %158 : vector<16x32xf32>
    %cst_85 = arith.constant dense<0.000000e+00> : vector<16xf32>
    %170 = vector.multi_reduction <add>, %169, %cst_85 [1] : vector<16x32xf32> to vector<16xf32>
    %171 = vector.shape_cast %170 : vector<16xf32> to vector<16x1xf32>
    %cst_86 = arith.constant 3.200000e+01 : f32
    %172 = vector.broadcast %cst_86 : f32 to vector<16x1xf32>
    %173 = arith.divf %171, %172 : vector<16x1xf32>
    %cst_87 = arith.constant 9.99999996E-13 : f32
    %174 = vector.broadcast %cst_87 : f32 to vector<16x1xf32>
    %175 = arith.addf %173, %174 : vector<16x1xf32>
    %176 = math.rsqrt %175 : vector<16x1xf32>
    %177 = vector.broadcast %176 : vector<16x1xf32> to vector<16x32xf32>
    %178 = arith.mulf %158, %177 : vector<16x32xf32>
    %179 = vector.broadcast %160 : vector<1x32xf32> to vector<16x32xf32>
    %180 = arith.mulf %178, %179 : vector<16x32xf32>
    %cst_88 = arith.constant dense<0.000000e+00> : vector<16x32xf32>
    %181 = tpu.matmul %180, %162, %cst_88 {dimension_numbers = #tpu.dot_dimension_numbers<[1], [0], [0], [1], [0, 0, 1, 1], [], []>} : vector<16x32xf32>, vector<32x32xf32>, vector<16x32xf32> -> vector<16x32xf32>
    %c1_89 = arith.constant 1 : index
    %c0_90 = arith.constant 0 : index
    %c0_91 = arith.constant 0 : index
    %182 = vector.load %arg5[%c1_89, %c0_90, %c0_91] : memref<2x1x32xf32, #tpu.memory_space<vmem>>, vector<1x1x32xf32>
    %183 = vector.shape_cast %182 : vector<1x1x32xf32> to vector<1x32xf32>
    %184 = vector.broadcast %183 : vector<1x32xf32> to vector<16x32xf32>
    %185 = arith.addf %181, %184 : vector<16x32xf32>
    %cst_92 = arith.constant dense<0.000000e+00> : vector<16x32xf32>
    %186 = tpu.matmul %180, %164, %cst_92 {dimension_numbers = #tpu.dot_dimension_numbers<[1], [0], [0], [1], [0, 0, 1, 1], [], []>} : vector<16x32xf32>, vector<32x32xf32>, vector<16x32xf32> -> vector<16x32xf32>
    %c1_93 = arith.constant 1 : index
    %c0_94 = arith.constant 0 : index
    %c0_95 = arith.constant 0 : index
    %187 = vector.load %arg7[%c1_93, %c0_94, %c0_95] : memref<2x1x32xf32, #tpu.memory_space<vmem>>, vector<1x1x32xf32>
    %188 = vector.shape_cast %187 : vector<1x1x32xf32> to vector<1x32xf32>
    %189 = vector.broadcast %188 : vector<1x32xf32> to vector<16x32xf32>
    %190 = arith.addf %186, %189 : vector<16x32xf32>
    %cst_96 = arith.constant dense<0.000000e+00> : vector<16x32xf32>
    %191 = tpu.matmul %180, %166, %cst_96 {dimension_numbers = #tpu.dot_dimension_numbers<[1], [0], [0], [1], [0, 0, 1, 1], [], []>} : vector<16x32xf32>, vector<32x32xf32>, vector<16x32xf32> -> vector<16x32xf32>
    %c1_97 = arith.constant 1 : index
    %c0_98 = arith.constant 0 : index
    %c0_99 = arith.constant 0 : index
    %192 = vector.load %arg9[%c1_97, %c0_98, %c0_99] : memref<2x1x32xf32, #tpu.memory_space<vmem>>, vector<1x1x32xf32>
    %193 = vector.shape_cast %192 : vector<1x1x32xf32> to vector<1x32xf32>
    %194 = vector.broadcast %193 : vector<1x32xf32> to vector<16x32xf32>
    %195 = arith.addf %191, %194 : vector<16x32xf32>
    %196 = vector.shape_cast %185 : vector<16x32xf32> to vector<2x8x32xf32>
    %cst_100 = arith.constant 0.353553385 : f32
    %197 = vector.broadcast %cst_100 : f32 to vector<2x8x32xf32>
    %198 = arith.mulf %196, %197 : vector<2x8x32xf32>
    %199 = vector.shape_cast %190 : vector<16x32xf32> to vector<2x8x32xf32>
    %200 = vector.shape_cast %195 : vector<16x32xf32> to vector<2x8x32xf32>
    %cst_101 = arith.constant 0.000000e+00 : f32
    %201 = vector.broadcast %cst_101 : f32 to vector<16x32xf32>
    %202 = vector.extract_strided_slice %198 {offsets = [0, 0, 0], sizes = [2, 8, 8], strides = [1, 1, 1]} : vector<2x8x32xf32> to vector<2x8x8xf32>
    %203 = vector.extract_strided_slice %199 {offsets = [0, 0, 0], sizes = [2, 8, 8], strides = [1, 1, 1]} : vector<2x8x32xf32> to vector<2x8x8xf32>
    "tpu.trace_start"() <{level = 10 : i32, message = "bqd,bkd->bqk"}> : () -> ()
    %cst_102 = arith.constant dense<0.000000e+00> : vector<2x8x8xf32>
    %204 = tpu.matmul %202, %203, %cst_102 {dimension_numbers = #tpu.dot_dimension_numbers<[2], [2], [1], [1], [0, 0, 0, 1, 1, 1], [0], [0]>} : vector<2x8x8xf32>, vector<2x8x8xf32>, vector<2x8x8xf32> -> vector<2x8x8xf32>
    "tpu.trace_stop"() : () -> ()
    %c0_103 = arith.constant 0 : index
    %c0_104 = arith.constant 0 : index
    %c0_105 = arith.constant 0 : index
    %205 = vector.load %arg2[%c0_103, %c0_104, %c0_105] : memref<4x8x8xf32, #tpu.memory_space<vmem>>, vector<1x8x8xf32>
    %206 = vector.shape_cast %205 : vector<1x8x8xf32> to vector<8x8xf32>
    %207 = vector.shape_cast %206 : vector<8x8xf32> to vector<1x8x8xf32>
    %208 = vector.broadcast %207 : vector<1x8x8xf32> to vector<2x8x8xf32>
    %209 = arith.addf %204, %208 : vector<2x8x8xf32>
    %cst_106 = arith.constant dense<0xFF800000> : vector<2x8xf32>
    %210 = vector.multi_reduction <maximumf>, %209, %cst_106 [2] : vector<2x8x8xf32> to vector<2x8xf32>
    %211 = vector.shape_cast %210 : vector<2x8xf32> to vector<2x8x1xf32>
    %212 = vector.broadcast %211 : vector<2x8x1xf32> to vector<2x8x8xf32>
    %213 = arith.subf %209, %212 : vector<2x8x8xf32>
    %214 = math.exp %213 : vector<2x8x8xf32>
    %cst_107 = arith.constant dense<0.000000e+00> : vector<2x8xf32>
    %215 = vector.multi_reduction <add>, %214, %cst_107 [2] : vector<2x8x8xf32> to vector<2x8xf32>
    %216 = vector.shape_cast %215 : vector<2x8xf32> to vector<2x8x1xf32>
    %217 = tpu.reciprocal %216 {approx = true} : vector<2x8x1xf32> -> vector<2x8x1xf32>
    %218 = vector.broadcast %217 : vector<2x8x1xf32> to vector<2x8x8xf32>
    %219 = arith.mulf %214, %218 : vector<2x8x8xf32>
    %220 = arith.addf %14, %219 : vector<2x8x8xf32>
    %221 = vector.extract_strided_slice %200 {offsets = [0, 0, 0], sizes = [2, 8, 8], strides = [1, 1, 1]} : vector<2x8x32xf32> to vector<2x8x8xf32>
    "tpu.trace_start"() <{level = 10 : i32, message = "bqk,bkd->bqd"}> : () -> ()
    %cst_108 = arith.constant dense<0.000000e+00> : vector<2x8x8xf32>
    %222 = tpu.matmul %219, %221, %cst_108 {dimension_numbers = #tpu.dot_dimension_numbers<[2], [1], [1], [2], [0, 0, 0, 1, 1, 2], [0], [0]>} : vector<2x8x8xf32>, vector<2x8x8xf32>, vector<2x8x8xf32> -> vector<2x8x8xf32>
    "tpu.trace_stop"() : () -> ()
    %223 = vector.shape_cast %222 : vector<2x8x8xf32> to vector<16x8xf32>
    %224 = vector.extract_strided_slice %168 {offsets = [0, 0], sizes = [8, 32], strides = [1, 1]} : vector<32x32xf32> to vector<8x32xf32>
    %cst_109 = arith.constant dense<0.000000e+00> : vector<16x32xf32>
    %225 = tpu.matmul %223, %224, %cst_109 {dimension_numbers = #tpu.dot_dimension_numbers<[1], [0], [0], [1], [0, 0, 1, 1], [], []>} : vector<16x8xf32>, vector<8x32xf32>, vector<16x32xf32> -> vector<16x32xf32>
    %226 = arith.addf %201, %225 : vector<16x32xf32>
    %227 = vector.extract_strided_slice %198 {offsets = [0, 0, 8], sizes = [2, 8, 8], strides = [1, 1, 1]} : vector<2x8x32xf32> to vector<2x8x8xf32>
    %228 = vector.extract_strided_slice %199 {offsets = [0, 0, 8], sizes = [2, 8, 8], strides = [1, 1, 1]} : vector<2x8x32xf32> to vector<2x8x8xf32>
    "tpu.trace_start"() <{level = 10 : i32, message = "bqd,bkd->bqk"}> : () -> ()
    %cst_110 = arith.constant dense<0.000000e+00> : vector<2x8x8xf32>
    %229 = tpu.matmul %227, %228, %cst_110 {dimension_numbers = #tpu.dot_dimension_numbers<[2], [2], [1], [1], [0, 0, 0, 1, 1, 1], [0], [0]>} : vector<2x8x8xf32>, vector<2x8x8xf32>, vector<2x8x8xf32> -> vector<2x8x8xf32>
    "tpu.trace_stop"() : () -> ()
    %c1_111 = arith.constant 1 : index
    %c0_112 = arith.constant 0 : index
    %c0_113 = arith.constant 0 : index
    %230 = vector.load %arg2[%c1_111, %c0_112, %c0_113] : memref<4x8x8xf32, #tpu.memory_space<vmem>>, vector<1x8x8xf32>
    %231 = vector.shape_cast %230 : vector<1x8x8xf32> to vector<8x8xf32>
    %232 = vector.shape_cast %231 : vector<8x8xf32> to vector<1x8x8xf32>
    %233 = vector.broadcast %232 : vector<1x8x8xf32> to vector<2x8x8xf32>
    %234 = arith.addf %229, %233 : vector<2x8x8xf32>
    %cst_114 = arith.constant dense<0xFF800000> : vector<2x8xf32>
    %235 = vector.multi_reduction <maximumf>, %234, %cst_114 [2] : vector<2x8x8xf32> to vector<2x8xf32>
    %236 = vector.shape_cast %235 : vector<2x8xf32> to vector<2x8x1xf32>
    %237 = vector.broadcast %236 : vector<2x8x1xf32> to vector<2x8x8xf32>
    %238 = arith.subf %234, %237 : vector<2x8x8xf32>
    %239 = math.exp %238 : vector<2x8x8xf32>
    %cst_115 = arith.constant dense<0.000000e+00> : vector<2x8xf32>
    %240 = vector.multi_reduction <add>, %239, %cst_115 [2] : vector<2x8x8xf32> to vector<2x8xf32>
    %241 = vector.shape_cast %240 : vector<2x8xf32> to vector<2x8x1xf32>
    %242 = tpu.reciprocal %241 {approx = true} : vector<2x8x1xf32> -> vector<2x8x1xf32>
    %243 = vector.broadcast %242 : vector<2x8x1xf32> to vector<2x8x8xf32>
    %244 = arith.mulf %239, %243 : vector<2x8x8xf32>
    %245 = arith.addf %220, %244 : vector<2x8x8xf32>
    %246 = vector.extract_strided_slice %200 {offsets = [0, 0, 8], sizes = [2, 8, 8], strides = [1, 1, 1]} : vector<2x8x32xf32> to vector<2x8x8xf32>
    "tpu.trace_start"() <{level = 10 : i32, message = "bqk,bkd->bqd"}> : () -> ()
    %cst_116 = arith.constant dense<0.000000e+00> : vector<2x8x8xf32>
    %247 = tpu.matmul %244, %246, %cst_116 {dimension_numbers = #tpu.dot_dimension_numbers<[2], [1], [1], [2], [0, 0, 0, 1, 1, 2], [0], [0]>} : vector<2x8x8xf32>, vector<2x8x8xf32>, vector<2x8x8xf32> -> vector<2x8x8xf32>
    "tpu.trace_stop"() : () -> ()
    %248 = vector.shape_cast %247 : vector<2x8x8xf32> to vector<16x8xf32>
    %249 = vector.extract_strided_slice %168 {offsets = [8, 0], sizes = [8, 32], strides = [1, 1]} : vector<32x32xf32> to vector<8x32xf32>
    %cst_117 = arith.constant dense<0.000000e+00> : vector<16x32xf32>
    %250 = tpu.matmul %248, %249, %cst_117 {dimension_numbers = #tpu.dot_dimension_numbers<[1], [0], [0], [1], [0, 0, 1, 1], [], []>} : vector<16x8xf32>, vector<8x32xf32>, vector<16x32xf32> -> vector<16x32xf32>
    %251 = arith.addf %226, %250 : vector<16x32xf32>
    %252 = vector.extract_strided_slice %198 {offsets = [0, 0, 16], sizes = [2, 8, 8], strides = [1, 1, 1]} : vector<2x8x32xf32> to vector<2x8x8xf32>
    %253 = vector.extract_strided_slice %199 {offsets = [0, 0, 16], sizes = [2, 8, 8], strides = [1, 1, 1]} : vector<2x8x32xf32> to vector<2x8x8xf32>
    "tpu.trace_start"() <{level = 10 : i32, message = "bqd,bkd->bqk"}> : () -> ()
    %cst_118 = arith.constant dense<0.000000e+00> : vector<2x8x8xf32>
    %254 = tpu.matmul %252, %253, %cst_118 {dimension_numbers = #tpu.dot_dimension_numbers<[2], [2], [1], [1], [0, 0, 0, 1, 1, 1], [0], [0]>} : vector<2x8x8xf32>, vector<2x8x8xf32>, vector<2x8x8xf32> -> vector<2x8x8xf32>
    "tpu.trace_stop"() : () -> ()
    %c2_119 = arith.constant 2 : index
    %c0_120 = arith.constant 0 : index
    %c0_121 = arith.constant 0 : index
    %255 = vector.load %arg2[%c2_119, %c0_120, %c0_121] : memref<4x8x8xf32, #tpu.memory_space<vmem>>, vector<1x8x8xf32>
    %256 = vector.shape_cast %255 : vector<1x8x8xf32> to vector<8x8xf32>
    %257 = vector.shape_cast %256 : vector<8x8xf32> to vector<1x8x8xf32>
    %258 = vector.broadcast %257 : vector<1x8x8xf32> to vector<2x8x8xf32>
    %259 = arith.addf %254, %258 : vector<2x8x8xf32>
    %cst_122 = arith.constant dense<0xFF800000> : vector<2x8xf32>
    %260 = vector.multi_reduction <maximumf>, %259, %cst_122 [2] : vector<2x8x8xf32> to vector<2x8xf32>
    %261 = vector.shape_cast %260 : vector<2x8xf32> to vector<2x8x1xf32>
    %262 = vector.broadcast %261 : vector<2x8x1xf32> to vector<2x8x8xf32>
    %263 = arith.subf %259, %262 : vector<2x8x8xf32>
    %264 = math.exp %263 : vector<2x8x8xf32>
    %cst_123 = arith.constant dense<0.000000e+00> : vector<2x8xf32>
    %265 = vector.multi_reduction <add>, %264, %cst_123 [2] : vector<2x8x8xf32> to vector<2x8xf32>
    %266 = vector.shape_cast %265 : vector<2x8xf32> to vector<2x8x1xf32>
    %267 = tpu.reciprocal %266 {approx = true} : vector<2x8x1xf32> -> vector<2x8x1xf32>
    %268 = vector.broadcast %267 : vector<2x8x1xf32> to vector<2x8x8xf32>
    %269 = arith.mulf %264, %268 : vector<2x8x8xf32>
    %270 = arith.addf %245, %269 : vector<2x8x8xf32>
    %271 = vector.extract_strided_slice %200 {offsets = [0, 0, 16], sizes = [2, 8, 8], strides = [1, 1, 1]} : vector<2x8x32xf32> to vector<2x8x8xf32>
    "tpu.trace_start"() <{level = 10 : i32, message = "bqk,bkd->bqd"}> : () -> ()
    %cst_124 = arith.constant dense<0.000000e+00> : vector<2x8x8xf32>
    %272 = tpu.matmul %269, %271, %cst_124 {dimension_numbers = #tpu.dot_dimension_numbers<[2], [1], [1], [2], [0, 0, 0, 1, 1, 2], [0], [0]>} : vector<2x8x8xf32>, vector<2x8x8xf32>, vector<2x8x8xf32> -> vector<2x8x8xf32>
    "tpu.trace_stop"() : () -> ()
    %273 = vector.shape_cast %272 : vector<2x8x8xf32> to vector<16x8xf32>
    %274 = vector.extract_strided_slice %168 {offsets = [16, 0], sizes = [8, 32], strides = [1, 1]} : vector<32x32xf32> to vector<8x32xf32>
    %cst_125 = arith.constant dense<0.000000e+00> : vector<16x32xf32>
    %275 = tpu.matmul %273, %274, %cst_125 {dimension_numbers = #tpu.dot_dimension_numbers<[1], [0], [0], [1], [0, 0, 1, 1], [], []>} : vector<16x8xf32>, vector<8x32xf32>, vector<16x32xf32> -> vector<16x32xf32>
    %276 = arith.addf %251, %275 : vector<16x32xf32>
    %277 = vector.extract_strided_slice %198 {offsets = [0, 0, 24], sizes = [2, 8, 8], strides = [1, 1, 1]} : vector<2x8x32xf32> to vector<2x8x8xf32>
    %278 = vector.extract_strided_slice %199 {offsets = [0, 0, 24], sizes = [2, 8, 8], strides = [1, 1, 1]} : vector<2x8x32xf32> to vector<2x8x8xf32>
    "tpu.trace_start"() <{level = 10 : i32, message = "bqd,bkd->bqk"}> : () -> ()
    %cst_126 = arith.constant dense<0.000000e+00> : vector<2x8x8xf32>
    %279 = tpu.matmul %277, %278, %cst_126 {dimension_numbers = #tpu.dot_dimension_numbers<[2], [2], [1], [1], [0, 0, 0, 1, 1, 1], [0], [0]>} : vector<2x8x8xf32>, vector<2x8x8xf32>, vector<2x8x8xf32> -> vector<2x8x8xf32>
    "tpu.trace_stop"() : () -> ()
    %c3_127 = arith.constant 3 : index
    %c0_128 = arith.constant 0 : index
    %c0_129 = arith.constant 0 : index
    %280 = vector.load %arg2[%c3_127, %c0_128, %c0_129] : memref<4x8x8xf32, #tpu.memory_space<vmem>>, vector<1x8x8xf32>
    %281 = vector.shape_cast %280 : vector<1x8x8xf32> to vector<8x8xf32>
    %282 = vector.shape_cast %281 : vector<8x8xf32> to vector<1x8x8xf32>
    %283 = vector.broadcast %282 : vector<1x8x8xf32> to vector<2x8x8xf32>
    %284 = arith.addf %279, %283 : vector<2x8x8xf32>
    %cst_130 = arith.constant dense<0xFF800000> : vector<2x8xf32>
    %285 = vector.multi_reduction <maximumf>, %284, %cst_130 [2] : vector<2x8x8xf32> to vector<2x8xf32>
    %286 = vector.shape_cast %285 : vector<2x8xf32> to vector<2x8x1xf32>
    %287 = vector.broadcast %286 : vector<2x8x1xf32> to vector<2x8x8xf32>
    %288 = arith.subf %284, %287 : vector<2x8x8xf32>
    %289 = math.exp %288 : vector<2x8x8xf32>
    %cst_131 = arith.constant dense<0.000000e+00> : vector<2x8xf32>
    %290 = vector.multi_reduction <add>, %289, %cst_131 [2] : vector<2x8x8xf32> to vector<2x8xf32>
    %291 = vector.shape_cast %290 : vector<2x8xf32> to vector<2x8x1xf32>
    %292 = tpu.reciprocal %291 {approx = true} : vector<2x8x1xf32> -> vector<2x8x1xf32>
    %293 = vector.broadcast %292 : vector<2x8x1xf32> to vector<2x8x8xf32>
    %294 = arith.mulf %289, %293 : vector<2x8x8xf32>
    %295 = arith.addf %270, %294 : vector<2x8x8xf32>
    %296 = vector.extract_strided_slice %200 {offsets = [0, 0, 24], sizes = [2, 8, 8], strides = [1, 1, 1]} : vector<2x8x32xf32> to vector<2x8x8xf32>
    "tpu.trace_start"() <{level = 10 : i32, message = "bqk,bkd->bqd"}> : () -> ()
    %cst_132 = arith.constant dense<0.000000e+00> : vector<2x8x8xf32>
    %297 = tpu.matmul %294, %296, %cst_132 {dimension_numbers = #tpu.dot_dimension_numbers<[2], [1], [1], [2], [0, 0, 0, 1, 1, 2], [0], [0]>} : vector<2x8x8xf32>, vector<2x8x8xf32>, vector<2x8x8xf32> -> vector<2x8x8xf32>
    "tpu.trace_stop"() : () -> ()
    %298 = vector.shape_cast %297 : vector<2x8x8xf32> to vector<16x8xf32>
    %299 = vector.extract_strided_slice %168 {offsets = [24, 0], sizes = [8, 32], strides = [1, 1]} : vector<32x32xf32> to vector<8x32xf32>
    %cst_133 = arith.constant dense<0.000000e+00> : vector<16x32xf32>
    %300 = tpu.matmul %298, %299, %cst_133 {dimension_numbers = #tpu.dot_dimension_numbers<[1], [0], [0], [1], [0, 0, 1, 1], [], []>} : vector<16x8xf32>, vector<8x32xf32>, vector<16x32xf32> -> vector<16x32xf32>
    %301 = arith.addf %276, %300 : vector<16x32xf32>
    %302 = arith.addf %158, %301 : vector<16x32xf32>
    %c1_134 = arith.constant 1 : index
    %c0_135 = arith.constant 0 : index
    %c0_136 = arith.constant 0 : index
    %303 = vector.load %arg11[%c1_134, %c0_135, %c0_136] : memref<2x1x32xf32, #tpu.memory_space<vmem>>, vector<1x1x32xf32>
    %304 = vector.shape_cast %303 : vector<1x1x32xf32> to vector<1x32xf32>
    %305 = vector.broadcast %304 : vector<1x32xf32> to vector<16x32xf32>
    %306 = arith.addf %302, %305 : vector<16x32xf32>
    %c0_137 = arith.constant 0 : index
    %c0_138 = arith.constant 0 : index
    %307 = vector.load %arg1[%c0_137, %c0_138] : memref<1x32xf32, #tpu.memory_space<vmem>>, vector<1x32xf32>
    %308 = arith.mulf %306, %306 : vector<16x32xf32>
    %cst_139 = arith.constant dense<0.000000e+00> : vector<16xf32>
    %309 = vector.multi_reduction <add>, %308, %cst_139 [1] : vector<16x32xf32> to vector<16xf32>
    %310 = vector.shape_cast %309 : vector<16xf32> to vector<16x1xf32>
    %cst_140 = arith.constant 3.200000e+01 : f32
    %311 = vector.broadcast %cst_140 : f32 to vector<16x1xf32>
    %312 = arith.divf %310, %311 : vector<16x1xf32>
    %cst_141 = arith.constant 9.99999997E-7 : f32
    %313 = vector.broadcast %cst_141 : f32 to vector<16x1xf32>
    %314 = arith.addf %312, %313 : vector<16x1xf32>
    %315 = math.rsqrt %314 : vector<16x1xf32>
    %316 = vector.broadcast %315 : vector<16x1xf32> to vector<16x32xf32>
    %317 = arith.mulf %306, %316 : vector<16x32xf32>
    %318 = vector.broadcast %307 : vector<1x32xf32> to vector<16x32xf32>
    %319 = arith.mulf %317, %318 : vector<16x32xf32>
    %c0_142 = arith.constant 0 : index
    %c0_143 = arith.constant 0 : index
    %320 = vector.load %arg12[%c0_142, %c0_143] : memref<16x32xf32, #tpu.memory_space<vmem>>, vector<16x32xf32>
    tpu.vector_store %arg12[%c0_142, %c0_143], %319 {strides = array<i32>} : memref<16x32xf32, #tpu.memory_space<vmem>>, vector<16x32xf32>,
    %c0_144 = arith.constant 0 : index
    %c0_145 = arith.constant 0 : index
    %c0_146 = arith.constant 0 : index
    %321 = vector.load %arg13[%c0_144, %c0_145, %c0_146] : memref<2x8x8xf32, #tpu.memory_space<vmem>>, vector<2x8x8xf32>
    tpu.vector_store %arg13[%c0_144, %c0_145, %c0_146], %295 {strides = array<i32>} : memref<2x8x8xf32, #tpu.memory_space<vmem>>, vector<2x8x8xf32>,
    return
  }
}

</mosaic_0001>

<bundles_post_ra>
// kernel: tpu_custom_call.1
= control target key start
LH: loop header
LB: loop body
LE: loop exit
PB: predicated region body
PF: predicated region fallthrough
CT: control target
= control target key end

     0   :  { %19 = vsyncpa [#allocation3], 0  ;;  %s2775_s0 = inlined_call_operand.hbm [shape: f32[16,32], index: 0, kind: input, shape index: {}]   ;;  %s2776_s1 = inlined_call_operand.hbm [shape: f32[1,32], index: 1, kind: input, shape index: {}]   ;;  %s2777_s2 = inlined_call_operand.hbm [shape: f32[4,8,8], index: 2, kind: input, shape index: {}]   ;;  %s2778_s3 = inlined_call_operand.vmem [shape: f32[2,1,32], index: 3, kind: input, shape index: {}]   ;;  %s2779_s4 = inlined_call_operand.hbm [shape: f32[2,32,32], index: 4, kind: input, shape index: {}]   ;;  %s2780_s5 = inlined_call_operand.vmem [shape: f32[2,1,32], index: 5, kind: input, shape index: {}]   ;;  %s2781_s6 = inlined_call_operand.hbm [shape: f32[2,32,32], index: 6, kind: input, shape index: {}]   ;;  %s2782_s7 = inlined_call_operand.vmem [shape: f32[2,1,32], index: 7, kind: input, shape index: {}]   ;;  %s2783_s8 = inlined_call_operand.hbm [shape: f32[2,32,32], index: 8, kind: input, shape index: {}]   ;;  %s2784_s9 = inlined_call_operand.vmem [shape: f32[2,1,32], index: 9, kind: input, shape index: {}]   ;;  %s2785_s10 = inlined_call_operand.hbm [shape: f32[2,32,32], index: 10, kind: input, shape index: {}]   ;;  %s2786_s11 = inlined_call_operand.vmem [shape: f32[2,1,32], index: 11, kind: input, shape index: {}]   ;;  %s2787_s12 = inlined_call_operand.hbm [shape: f32[16,32], index: 12, kind: output, shape index: {0}]   ;;  %s2788_s13 = inlined_call_operand.hbm [shape: f32[2,8,8], index: 13, kind: output, shape index: {1}]  }
   0x1   :  { %20 = vsyncpa [#allocation6], 0 }
   0x2   :  { %21 = vsyncpa [#allocation9], 0 }
   0x3   :  { %22 = vsyncpa [#allocation12], 0 }
   0x4   :  { %23 = vsyncpa [#allocation4], 0  ;;  %s43_s27 = sshll.u32 %s2776_s1, 4  ;;  %s44_s27 = int_to_ptr.hbm [resolvable:$true] %s43_s27 }
   0x5   :  { %24 = vsyncpa [#allocation16], 0  ;;  %s2307_s28 = smov [#allocation5]   ;;  %s68_s15 = sshll.u32 %s2779_s4, 4  ;;  %s69_s15 = int_to_ptr.hbm [resolvable:$true] %s68_s15 }
   0x6   :  { %s45_s29 = sshll.u32 %s2307_s28, 4  ;;  %s2308_s16 = smov [#allocation8]   ;;  %s46_s29 = int_to_ptr.vmem [resolvable:$true] %s45_s29 }
   0x7   :  { %48 = dma.hbm_to_vmem [thread:$0]  %s44_s27, 16, %s46_s29, [#allocation6]  }
   0x8   :  { %s70_s17 = sshll.u32 %s2308_s16, 4  ;;  %s98_s20 = sshll.u32 %s2783_s8, 4  ;;  %s71_s17 = int_to_ptr.vmem [resolvable:$true] %s70_s17  ;;  %s99_s20 = int_to_ptr.hbm [resolvable:$true] %s98_s20 }
   0x9   :  { %s2309_s1 = smov 128   ;;  %s2310_s21 = smov 8  }
   0xa   :  { %76 = dma.hbm_to_vmem [thread:$0]  %s69_s15, 1024, %s71_s17, [#allocation9], %s2309_s1, %s2309_s1, %s2310_s21  }
   0xb   :  { %s29_s24 = sshll.u32 %s2775_s0, 4  ;;  %s2311_s4 = smov [#allocation11]   ;;  %s30_s24 = int_to_ptr.hbm [resolvable:$true] %s29_s24 }
   0xc   :  { %s100_s25 = sshll.u32 %s2311_s4, 4  ;;  %s2312_s8 = smov [#allocation2]   ;;  %s101_s25 = int_to_ptr.vmem [resolvable:$true] %s100_s25 }
   0xd   :  { %106 = dma.hbm_to_vmem [thread:$0]  %s99_s20, 1024, %s101_s25, [#allocation12], %s2309_s1, %s2309_s1, %s2310_s21  }
   0xe   :  { %s31_s26 = sshll.u32 %s2312_s8, 4  ;;  %s53_s29 = sshll.u32 %s2777_s2, 4  ;;  %s32_s26 = int_to_ptr.vmem [resolvable:$true] %s31_s26  ;;  %s54_s29 = int_to_ptr.hbm [resolvable:$true] %s53_s29 }
   0xf   :  { %37 = dma.hbm_to_vmem [thread:$0]  %s30_s24, 256, %s32_s26, [#allocation3], %s2309_s1, %s2309_s1, %s2310_s21  }
  0x10   :  { %s83_s14 = sshll.u32 %s2781_s6, 4  ;;  %s2313_s15 = smov [#allocation7]   ;;  %s84_s14 = int_to_ptr.hbm [resolvable:$true] %s83_s14 }
  0x11   :  { %s55_s16 = sshll.u32 %s2313_s15, 4  ;;  %s2314_s17 = smov [#allocation10]   ;;  %s56_s16 = int_to_ptr.vmem [resolvable:$true] %s55_s16 }
  0x12   :  { %61 = dma.hbm_to_vmem [thread:$0]  %s54_s29, 512, %s56_s16, [#allocation6], %s2309_s1, %s2309_s1, %s2310_s21  }
  0x13   :  { %s85_s2 = sshll.u32 %s2314_s17, 4  ;;  %s113_s20 = sshll.u32 %s2785_s10, 4  ;;  %s86_s2 = int_to_ptr.vmem [resolvable:$true] %s85_s2  ;;  %s114_s20 = int_to_ptr.hbm [resolvable:$true] %s113_s20 }
  0x14   :  { %91 = dma.hbm_to_vmem [thread:$0]  %s84_s14, 1024, %s86_s2, [#allocation9], %s2309_s1, %s2309_s1, %s2310_s21  }
  0x15   :  { %s2315_s6 = smov [#allocation13]  }
  0x16   :  { %s115_s22 = sshll.u32 %s2315_s6, 4  ;;  %s116_s22 = int_to_ptr.vmem [resolvable:$true] %s115_s22 }
  0x17   :  { %121 = dma.hbm_to_vmem [thread:$0]  %s114_s20, 1024, %s116_s22, [#allocation12], %s2309_s1, %s2309_s1, %s2310_s21  }
  0x18   :  { %2295 = dma.done.wait [#allocation3], 256  }
  0x19   :  { %2296 = vsyncadd [#allocation3], 4294967040 }
  0x1a   :  { %2297 = dma.done.wait [#allocation6], 528  }
  0x1b   :  { %2298 = vsyncadd [#allocation6], 4294966768 }
  0x1c   :  { %2299 = dma.done.wait [#allocation9], 2048  }
  0x1d   :  { %2300 = vsyncadd [#allocation9], 4294965248 }
  0x1e   :  { %2301 = dma.done.wait [#allocation12], 2048  }
  0x1f   :  { %2302 = vsyncadd [#allocation12], 4294965248  ;;  %v152_v0 = vld [vmem:[#allocation2] sm:$0xff]  ;;  %vm157_vm0 = vcmask 261120   ;;  %v153_v2 = vld [vmem:[#allocation2 + $0x8] sm:$0xff]  ;;  %v2316_v6 = vmov 32.0  }
  0x20   :  { %v155_v1 = vmul.f32 %v152_v0, %v152_v0  ;;  %v156_v4 = vmul.f32 %v153_v2, %v153_v2  ;;  %1997 = vrcp.f32 %v2316_v6  ;;  %v1985_v27 = vld [vmem:[#allocation5] ss:$0 sm:$0xff]  ;;  %v205_v44 = vld [vmem:[#allocation8 + $0x10] sm:$0xff]  ;;  %v204_v46 = vld [vmem:[#allocation8 + $0x8] sm:$0xff]  ;;  %vm348_vm14 = vcmask 64512   ;;  %s2317_s26 = smov 120  }
  0x21   :  { %v206_v42 = vld [vmem:[#allocation8 + $0x18] sm:$0xff]  ;;  %v209_v45 = vld [vmem:[#allocation10 + $0x10] sm:$0xff]  ;;  %v208_v47 = vld [vmem:[#allocation10 + $0x8] sm:$0xff]  ;;  %s2318_s29 = smov 112   ;;  %s2319_s0 = smov 104  }
  0x22   :  { %v158_v3 = vsel %vm157_vm0, %v155_v1, 0.0  ;;  %v161_v5 = vsel %vm157_vm0, %v156_v4, 0.0  ;;  %v210_v43 = vld [vmem:[#allocation10 + $0x18] sm:$0xff]  ;;  %280 = vmatpush.msra.mxu0 %v206_v42  ;;  %v203_v48 = vld [vmem:[#allocation8] sm:$0xff]  ;;  %v213_v54 = vld [vmem:[#allocation11 + $0x10] sm:$0xff]  ;;  %s1864_s10 = sshll.u32 %s2788_s13, 4  ;;  %s1865_s10 = int_to_ptr.hbm [resolvable:$true] %s1864_s10 }
  0x23   :  { %159 = vadd.xlane.f32.xlu0 %v158_v3  ;;  %307 = vmatpush.msra.mxu1 %v210_v43  ;;  %v207_v49 = vld [vmem:[#allocation10] sm:$0xff]  ;;  %v214_v53 = vld [vmem:[#allocation11 + $0x18] sm:$0xff]  ;;  %v212_v55 = vld [vmem:[#allocation11 + $0x8] sm:$0xff]  ;;  %s2321_s13 = smov [#allocation14]   ;;  %s1851_s25 = sshll.u32 %s2787_s12, 4  ;;  %s1852_s25 = int_to_ptr.hbm [resolvable:$true] %s1851_s25 }
  0x24   :  { %1966 = vmatpush.msra.mxu2 %v210_v43  ;;  %281 = vmatpush.msra.mxu0 %v205_v44  ;;  %v211_v56 = vld [vmem:[#allocation11] sm:$0xff]  ;;  %v1986_v4 = vld [vmem:[%s2778_s3] ss:$0 sm:$0xff]  ;;  %s1849_s23 = sshll.u32 %s2321_s13, 4  ;;  %s1850_s23 = int_to_ptr.vmem [resolvable:$true] %s1849_s23 }
  0x25   :  { %308 = vmatpush.msra.mxu1 %v209_v45 }
  0x26   :  { %v1998_v7 = vpop.eup %1997  ;;  %1967 = vmatpush.msra.mxu2 %v209_v45  ;;  %282 = vmatpush.msra.mxu0 %v204_v46  ;;  %v2507_v46 = vld [vmem:[#allocation7 + $0x8] sm:$0xff] }
  0x27   :  { %v165_v8 = vmul.f32 32.0, %v1998_v7  ;;  %vm169_vm1 = vweird.f32 %v1998_v7  ;;  %309 = vmatpush.msra.mxu1 %v208_v47 }
  0x28   :  { %1968 = vmatpush.msra.mxu2 %v208_v47  ;;  %283 = vmatpush.msra.mxu0 %v203_v48 }
  0x29   :  { %v166_v9 = vsub.f32 1.0, %v165_v8  ;;  %310 = vmatpush.msra.mxu1 %v207_v49 }
  0x2a   :  { %1969 = vmatpush.msra.mxu2 %v207_v49 }
  0x2b   :  { %162 = vadd.xlane.f32.xlu0 %v161_v5  ;;  %v167_v10 = vmul.f32 %v1998_v7, %v166_v9 }
  0x2c   :  { %334 = vmatpush.msrb.mxu2 %v214_v53 }
  0x2d   :  { %v168_v11 = vadd.f32 %v1998_v7, %v167_v10 }
  0x2e   :  { %335 = vmatpush.msrb.mxu2 %v213_v54 }
  0x2f   :  { %v2433_v12 = vsel %vm169_vm1, %v1998_v7, %v168_v11 }
  0x30   :  { %336 = vmatpush.msrb.mxu2 %v212_v55 }
  0x32   :  { %337 = vmatpush.msrb.mxu2 %v211_v56 }
  0x96   :  { %v160_v13 = vpop.xlane.xlu0 %159 }
  0x97   :  { %v171_v14 = vmul.f32 %v2433_v12, %v160_v13 }
  0x99   :  { %v173_v15 = vadd.f32 1e-06, %v171_v14 }
  0x9b   :  { %1999 = vrsqrt.f32 %v173_v15  ;;  %vm181_vm3 = vweird.f32 %v173_v15 }
  0x9e   :  { %v163_v16 = vpop.xlane.xlu0 %162 }
  0x9f   :  { %v172_v17 = vmul.f32 %v2433_v12, %v163_v16  ;;  %v1987_v16 = vld [vmem:[%s2780_s5] ss:$0 sm:$0xff] }
  0xa1   :  { %v2000_v18 = vpop.eup %1999  ;;  %v174_v19 = vadd.f32 1e-06, %v172_v17  ;;  %v1988_v17 = vld [vmem:[%s2782_s7] ss:$0 sm:$0xff] }
  0xa2   :  { %v176_v20 = vmul.f32 %v2000_v18, %v173_v15  ;;  %vm182_vm2 = vweird.f32 %v2000_v18 }
  0xa3   :  { %2001 = vrsqrt.f32 %v174_v19  ;;  %vm183_vm4 = vmor %vm181_vm3, %vm182_vm2  ;;  %vm191_vm5 = vweird.f32 %v174_v19 }
  0xa4   :  { %v177_v21 = vmul.f32 %v2000_v18, %v176_v20 }
  0xa6   :  { %v178_v22 = vmul.f32 0.5, %v177_v21 }
  0xa8   :  { %v179_v23 = vsub.f32 1.5, %v178_v22 }
  0xa9   :  { %v2002_v24 = vpop.eup %2001 }
  0xaa   :  { %v180_v25 = vmul.f32 %v2000_v18, %v179_v23  ;;  %v186_v26 = vmul.f32 %v2002_v24, %v174_v19  ;;  %vm192_vm6 = vweird.f32 %v2002_v24 }
  0xab   :  { %vm193_vm7 = vmor %vm191_vm5, %vm192_vm6 }
  0xac   :  { %v184_v28 = vsel %vm183_vm4, %v2000_v18, %v180_v25  ;;  %v187_v29 = vmul.f32 %v2002_v24, %v186_v26 }
  0xad   :  { %v195_v30 = vmul.f32 %v184_v28, %v152_v0  ;;  %v1989_v28 = vld [vmem:[%s2784_s9] ss:$0 sm:$0xff] }
  0xae   :  { %v188_v31 = vmul.f32 0.5, %v187_v29 }
  0xaf   :  { %v2437_v32 = vmul.f32 %v1985_v27, %v195_v30 }
  0xb0   :  { %v189_v33 = vsub.f32 1.5, %v188_v31 }
  0xb1   :  { %v219_v34 = vmul.f32 %v2437_v32, %v2437_v32 }
  0xb2   :  { %v190_v35 = vmul.f32 %v2002_v24, %v189_v33 }
  0xb3   :  { %v221_v36 = vsel %vm157_vm0, %v219_v34, 0.0 }
  0xb4   :  { %v194_v37 = vsel %vm193_vm7, %v2002_v24, %v190_v35  ;;  %222 = vadd.xlane.f32.xlu1 %v221_v36 }
  0xb5   :  { %v196_v38 = vmul.f32 %v194_v37, %v153_v2 }
  0xb7   :  { %v2442_v39 = vmul.f32 %v1985_v27, %v196_v38  ;;  %v2499_v38 = vld [vmem:[#allocation7] sm:$0xff] }
  0xb9   :  { %v220_v40 = vmul.f32 %v2442_v39, %v2442_v39 }
  0xbb   :  { %v224_v41 = vsel %vm157_vm0, %v220_v40, 0.0 }
  0xbc   :  { %225 = vadd.xlane.f32.xlu1 %v224_v41 }
 0x127   :  { %v223_v50 = vpop.xlane.xlu1 %222 }
 0x128   :  { %v227_v51 = vmul.f32 %v223_v50, %v2433_v12 }
 0x12a   :  { %v229_v52 = vadd.f32 1e-12, %v227_v51 }
 0x12c   :  { %2003 = vrsqrt.f32 %v229_v52  ;;  %vm237_vm9 = vweird.f32 %v229_v52 }
 0x12f   :  { %v226_v57 = vpop.xlane.xlu1 %225 }
 0x130   :  { %v228_v58 = vmul.f32 %v226_v57, %v2433_v12 }
 0x132   :  { %v2004_v59 = vpop.eup %2003  ;;  %v230_v60 = vadd.f32 1e-12, %v228_v58 }
 0x133   :  { %v232_v61 = vmul.f32 %v2004_v59, %v229_v52  ;;  %vm238_vm8 = vweird.f32 %v2004_v59 }
 0x134   :  { %2005 = vrsqrt.f32 %v230_v60  ;;  %vm239_vm10 = vmor %vm237_vm9, %vm238_vm8  ;;  %vm247_vm11 = vweird.f32 %v230_v60 }
 0x135   :  { %v233_v62 = vmul.f32 %v2004_v59, %v232_v61 }
 0x137   :  { %v234_v63 = vmul.f32 0.5, %v233_v62 }
 0x139   :  { %v235_v0 = vsub.f32 1.5, %v234_v63 }
 0x13a   :  { %v2006_v1 = vpop.eup %2005 }
 0x13b   :  { %v236_v2 = vmul.f32 %v2004_v59, %v235_v0  ;;  %v242_v3 = vmul.f32 %v2006_v1, %v230_v60  ;;  %vm248_vm12 = vweird.f32 %v2006_v1 }
 0x13c   :  { %vm249_vm13 = vmor %vm247_vm11, %vm248_vm12 }
 0x13d   :  { %v243_v5 = vmul.f32 %v2006_v1, %v242_v3  ;;  %v240_v6 = vsel %vm239_vm10, %v2004_v59, %v236_v2 }
 0x13e   :  { %v251_v7 = vmul.f32 %v240_v6, %v2437_v32 }
 0x13f   :  { %v244_v8 = vmul.f32 0.5, %v243_v5  ;;  %v215_v5 = vld [vmem:[#allocation13] sm:$0xff] }
 0x140   :  { %v256_v9 = vmul.f32 %v1986_v4, %v251_v7 }
 0x141   :  { %v245_v10 = vsub.f32 1.5, %v244_v8 }
 0x142   :  { %1885 = vmatmul.msk.f32.vlgmr.msra.gmra.mxu0 %vm157_vm0, %v256_v9  ;;  %1887 = vmatmul.msk.f32.vlgmr.msra.gmra.mxu1 %vm157_vm0, %v256_v9 }
 0x143   :  { %v246_v11 = vmul.f32 %v2006_v1, %v245_v10 }
 0x145   :  { %v250_v13 = vsel %vm249_vm13, %v2006_v1, %v246_v11 }
 0x146   :  { %v252_v14 = vmul.f32 %v250_v13, %v2442_v39 }
 0x148   :  { %v257_v15 = vmul.f32 %v1986_v4, %v252_v14 }
 0x14a   :  { %1886 = vmatmul.msk.f32.gmra.mxu0 %vm157_vm0, %v257_v15  ;;  %1888 = vmatmul.msk.f32.vlgmr.msra.gmra.mxu2 %vm157_vm0, %v257_v15 }
 0x152   :  { %1889 = vmatmul.msk.f32.vlgmr.msrb.gmra.mxu2 %vm157_vm0, %v256_v9 }
 0x15a   :  { %1890 = vmatmul.msk.f32.gmra.mxu2 %vm157_vm0, %v257_v15 }
 0x1bf   :  { %v285_v18 = vpop.f32.mrf.mxu0  ;;  %v312_v19 = vpop.f32.mrf.mxu1 }
 0x1c0   :  { %v286_v20 = vadd.f32 %v1987_v16, %v285_v18  ;;  %v2466_v21 = vadd.f32 %v1988_v17, %v312_v19 }
 0x1c2   :  { %v2468_v22 = vmul.f32 0.35355338, %v286_v20  ;;  %473 = vrot.lane.b32.xlu2 %v2466_v21, %s2317_s26  ;;  %1891 = vmatpush.xpose.msk.msra.mxu3 %vm348_vm14, %v2466_v21 }
 0x1c5   :  { %1892 = vmatmul.msk.f32.vlgmr.msra.gmra.mxu3 %vm348_vm14, %v2468_v22 }
 0x1c7   :  { %v288_v23 = vpop.f32.mrf.mxu0 }
 0x1c8   :  { %v289_v24 = vadd.f32 %v1987_v16, %v288_v23 }
 0x1ca   :  { %v2476_v25 = vmul.f32 0.35355338, %v289_v24  ;;  %471 = vrot.lane.b32.xlu2 %v2468_v22, %s2317_s26 }
 0x1cc   :  { %499 = vrot.lane.b32.xlu1 %v2476_v25, %s2317_s26 }
 0x1cd   :  { %v315_v26 = vpop.f32.mrf.mxu2 }
 0x1ce   :  { %v316_v27 = vadd.f32 %v1988_v17, %v315_v26 }
 0x1d0   :  { %501 = vrot.lane.b32.xlu0 %v316_v27, %s2317_s26  ;;  %1893 = vmatpush.xpose.msk.msrb.mxu3 %vm348_vm14, %v316_v27 }
 0x1d3   :  { %1894 = vmatmul.msk.f32.vlgmr.msrb.gmra.mxu3 %vm348_vm14, %v2476_v25 }
 0x1d5   :  { %v339_v29 = vpop.f32.mrf.mxu2 }
 0x1d6   :  { %v2489_v30 = vadd.f32 %v1989_v28, %v339_v29 }
 0x1d8   :  { %441 = vmatpush.msra.mxu3 %v2489_v30 }
 0x1dd   :  { %v342_v31 = vpop.f32.mrf.mxu2 }
 0x1de   :  { %v2492_v33 = vadd.f32 %v1989_v28, %v342_v31 }
 0x1e0   :  { %464 = vmatpush.msrb.mxu0 %v2492_v33 }
 0x21c   :  { %v474_v34 = vpop.permute.xlu2 %473 }
 0x21d   :  { %1897 = vmatpush.xpose.msk.msrb.mxu1 %vm348_vm14, %v474_v34 }
 0x224   :  { %v472_v35 = vpop.permute.xlu2 %471 }
 0x225   :  { %1898 = vmatmul.msk.f32.vlgmr.msrb.gmra.mxu1 %vm348_vm14, %v472_v35 }
 0x23e   :  { %v500_v37 = vpop.permute.xlu1 %499 }
 0x242   :  { %v502_v36 = vpop.permute.xlu0 %501 }
 0x243   :  { %1899 = vmatpush.xpose.msk.msra.mxu2 %vm348_vm14, %v502_v36  ;;  %v216_v36 = vld [vmem:[#allocation13 + $0x8] sm:$0xff] }
 0x244   :  { %624 = vmatpush.msra.mxu1 %v216_v36 }
 0x246   :  { %1900 = vmatmul.msk.f32.vlgmr.msra.gmra.mxu2 %vm348_vm14, %v500_v37 }
 0x247   :  { %653 = vmatpush.msrb.mxu2 %v215_v5 }
 0x248   :  { %v372_v40 = vpop.f32.mrf.mxu3 }
 0x249   :  { %v373_v41 = vadd.f32 %v372_v40, %v2499_v38  ;;  %v2546_v40 = vld [vmem:[#allocation7 + $0x10] sm:$0xff] }
 0x24b   :  { %v401_v42 = vsel %vm348_vm14, %v373_v41, -inf }
 0x24c   :  { %402 = vmax.xlane.f32.xlu2 %v401_v42 }
 0x256   :  { %v398_v43 = vpop.f32.mrf.mxu3 }
 0x257   :  { %v399_v44 = vadd.f32 %v398_v43, %v2499_v38 }
 0x259   :  { %v404_v45 = vsel %vm348_vm14, %v399_v44, -inf }
 0x25a   :  { %405 = vmax.xlane.f32.xlu0 %v404_v45 }
 0x26e   :  { %550 = vrot.lane.b32.xlu0 %v2489_v30, %s2317_s26 }
 0x2a2   :  { %v496_v47 = vpop.f32.mrf.mxu1 }
 0x2a3   :  { %v497_v48 = vadd.f32 %v496_v47, %v2507_v46 }
 0x2a5   :  { %v527_v49 = vsel %vm348_vm14, %v497_v48, -inf }
 0x2a6   :  { %528 = vmax.xlane.f32.xlu1 %v527_v49 }
 0x2bf   :  { %v403_v50 = vpop.xlane.xlu2 %402  ;;  %663 = vrot.lane.b32.xlu1 %v2468_v22, %s2318_s29 }
 0x2c0   :  { %v407_v51 = vsub.f32 %v373_v41, %v403_v50 }
 0x2c2   :  { %v409_v52 = vmul.f32 1.442695, %v407_v51 }
 0x2c4   :  { %2007 = vpow2.f32 %v409_v52 }
 0x2c7   :  { %577 = vrot.lane.b32.xlu1 %v2492_v33, %s2317_s26 }
 0x2c9   :  { %v524_v53 = vpop.f32.mrf.mxu2 }
 0x2ca   :  { %v2008_v54 = vpop.eup %2007  ;;  %v525_v55 = vadd.f32 %v524_v53, %v2507_v46 }
 0x2cb   :  { %v413_v56 = vsel %vm348_vm14, %v2008_v54, 0.0 }
 0x2cc   :  { %414 = vadd.xlane.f32.xlu2 %v413_v56  ;;  %v530_v57 = vsel %vm348_vm14, %v525_v55, -inf }
 0x2cd   :  { %531 = vmax.xlane.f32.xlu0 %v530_v57  ;;  %v406_v58 = vpop.xlane.xlu0 %405 }
 0x2ce   :  { %v408_v59 = vsub.f32 %v399_v44, %v406_v58 }
 0x2cf   :  { %693 = vrot.lane.b32.xlu1 %v316_v27, %s2318_s29 }
 0x2d0   :  { %v411_v60 = vmul.f32 1.442695, %v408_v59 }
 0x2d2   :  { %2009 = vpow2.f32 %v411_v60 }
 0x2d7   :  { %828 = vrot.lane.b32.xlu1 %v2466_v21, %s2319_s0 }
 0x2d8   :  { %v2010_v61 = vpop.eup %2009 }
 0x2d9   :  { %v416_v62 = vsel %vm348_vm14, %v2010_v61, 0.0 }
 0x2da   :  { %417 = vadd.xlane.f32.xlu2 %v416_v62  ;;  %v2562_v62 = vld [vmem:[#allocation7 + $0x18] sm:$0xff] }
 0x2df   :  { %691 = vrot.lane.b32.xlu1 %v2476_v25, %s2318_s29 }
 0x2e0   :  { %v551_v63 = vpop.permute.xlu0 %550 }
 0x2e1   :  { %826 = vrot.lane.b32.xlu0 %v2468_v22, %s2319_s0  ;;  %571 = vmatpush.msrb.mxu3 %v551_v63 }
 0x2e9   :  { %856 = vrot.lane.b32.xlu0 %v316_v27, %s2319_s0 }
 0x2f1   :  { %854 = vrot.lane.b32.xlu0 %v2476_v25, %s2319_s0 }
 0x319   :  { %v529_v0 = vpop.xlane.xlu1 %528 }
 0x31a   :  { %v533_v1 = vsub.f32 %v497_v48, %v529_v0 }
 0x31c   :  { %v535_v2 = vmul.f32 1.442695, %v533_v1 }
 0x31e   :  { %2011 = vpow2.f32 %v535_v2 }
 0x324   :  { %v2012_v3 = vpop.eup %2011 }
 0x325   :  { %v539_v4 = vsel %vm348_vm14, %v2012_v3, 0.0 }
 0x326   :  { %540 = vadd.xlane.f32.xlu2 %v539_v4 }
 0x331   :  { %v664_v6 = vpop.permute.xlu1 %663 }
 0x339   :  { %v578_v7 = vpop.permute.xlu1 %577 }
 0x33a   :  { %598 = vmatpush.msra.mxu0 %v578_v7 }
 0x33e   :  { %665 = vrot.lane.b32.xlu2 %v2466_v21, %s2318_s29 }
 0x33f   :  { %v415_v8 = vpop.xlane.xlu2 %414 }
 0x340   :  { %2013 = vrcp.f32 %v415_v8  ;;  %v532_v15 = vpop.xlane.xlu0 %531 }
 0x341   :  { %v694_v9 = vpop.permute.xlu1 %693  ;;  %v534_v17 = vsub.f32 %v525_v55, %v532_v15 }
 0x343   :  { %v537_v19 = vmul.f32 1.442695, %v534_v17 }
 0x346   :  { %v2014_v10 = vpop.eup %2013 }
 0x347   :  { %v421_v11 = vmul.f32 %v2014_v10, %v2008_v54 }
 0x349   :  { %v829_v13 = vpop.permute.xlu1 %828  ;;  %1895 = vmatmul.msk.f32.vlgmr.msra.gmra.mxu3 %vm348_vm14, %v421_v11  ;;  %v217_v11 = vld [vmem:[#allocation13 + $0x10] sm:$0xff] }
 0x34a   :  { %1915 = vmatpush.xpose.msk.msra.mxu2 %vm348_vm14, %v829_v13  ;;  %814 = vmatpush.msrb.mxu1 %v217_v11 }
 0x34d   :  { %v418_v14 = vpop.xlane.xlu2 %417 }
 0x34e   :  { %2015 = vrcp.f32 %v418_v14 }
 0x34f   :  { %2017 = vpow2.f32 %v537_v19 }
 0x351   :  { %v692_v35 = vpop.permute.xlu1 %691 }
 0x353   :  { %v827_v29 = vpop.permute.xlu0 %826 }
 0x354   :  { %v2016_v16 = vpop.eup %2015 }
 0x355   :  { %v422_v18 = vmul.f32 %v2016_v16, %v2010_v61  ;;  %v2018_v20 = vpop.eup %2017 }
 0x356   :  { %v542_v21 = vsel %vm348_vm14, %v2018_v20, 0.0 }
 0x357   :  { %1896 = vmatmul.msk.f32.vlgmr.msrb.gmra.mxu0 %vm348_vm14, %v422_v18 }
 0x358   :  { %1909 = vmatpush.xpose.msk.msrb.mxu0 %vm348_vm14, %v694_v9 }
 0x35b   :  { %v857_v54 = vpop.permute.xlu0 %856 }
 0x363   :  { %v855_v56 = vpop.permute.xlu0 %854 }
 0x367   :  { %543 = vadd.xlane.f32.xlu2 %v542_v21 }
 0x399   :  { %v541_v22 = vpop.xlane.xlu2 %540 }
 0x39a   :  { %2019 = vrcp.f32 %v541_v22 }
 0x3a0   :  { %v2020_v23 = vpop.eup %2019 }
 0x3a1   :  { %v547_v24 = vmul.f32 %v2020_v23, %v2012_v3  ;;  %v666_v25 = vpop.permute.xlu2 %665 }
 0x3a2   :  { %1907 = vmatpush.xpose.msk.msra.mxu3 %vm348_vm14, %v666_v25 }
 0x3a3   :  { %1901 = vmatmul.msk.f32.vlgmr.msrb.gmra.mxu3 %vm348_vm14, %v547_v24 }
 0x3ab   :  { %1908 = vmatmul.msk.f32.vlgmr.msra.gmra.mxu3 %vm348_vm14, %v664_v6 }
 0x3cc   :  { %v443_v26 = vpop.f32.mrf.mxu3 }
 0x3cd   :  { %1905 = vmatmul.msk.f32.vlgmr.msrb.gmra.mxu2 %vm348_vm14, %v443_v26 }
 0x3d4   :  { %v466_v27 = vpop.f32.mrf.mxu0 }
 0x3d5   :  { %1906 = vmatmul.msk.f32.gmra.mxu2 %vm348_vm14, %v466_v27 }
 0x3da   :  { %v544_v28 = vpop.xlane.xlu2 %543 }
 0x3db   :  { %2021 = vrcp.f32 %v544_v28 }
 0x3dd   :  { %1916 = vmatmul.msk.f32.vlgmr.msra.gmra.mxu2 %vm348_vm14, %v827_v29 }
 0x3e1   :  { %v2022_v31 = vpop.eup %2021 }
 0x3e2   :  { %v548_v34 = vmul.f32 %v2022_v31, %v2018_v20  ;;  %v218_v31 = vld [vmem:[#allocation13 + $0x18] sm:$0xff] }
 0x3e4   :  { %1902 = vmatmul.msk.f32.vlgmr.msra.gmra.mxu0 %vm348_vm14, %v548_v34 }
 0x3ec   :  { %1910 = vmatmul.msk.f32.vlgmr.msrb.gmra.mxu0 %vm348_vm14, %v692_v35 }
 0x426   :  { %v573_v37 = vpop.f32.mrf.mxu3 }
 0x427   :  { %1903 = vmatmul.msk.f32.vlgmr.msra.gmra.mxu1 %vm348_vm14, %v573_v37 }
 0x42e   :  { %v688_v41 = vpop.f32.mrf.mxu3 }
 0x42f   :  { %v689_v42 = vadd.f32 %v688_v41, %v2546_v40 }
 0x431   :  { %v719_v43 = vsel %vm348_vm14, %v689_v42, -inf }
 0x432   :  { %720 = vmax.xlane.f32.xlu1 %v719_v43 }
 0x450   :  { %v2558_v55 = vpop.f32.mrf.mxu2 }
 0x458   :  { %v2560_v58 = vpop.f32.mrf.mxu2 }
 0x460   :  { %v851_v63 = vpop.f32.mrf.mxu2 }
 0x461   :  { %v600_v44 = vpop.f32.mrf.mxu0  ;;  %v852_v1 = vadd.f32 %v851_v63, %v2562_v62  ;;  %v999_v63 = vld [vmem:[#allocation8 + $0x28] sm:$0xff] }
 0x462   :  { %1904 = vmatmul.msk.f32.gmra.mxu1 %vm348_vm14, %v600_v44 }
 0x469   :  { %v716_v45 = vpop.f32.mrf.mxu0 }
 0x46a   :  { %v717_v47 = vadd.f32 %v716_v45, %v2546_v40 }
 0x46c   :  { %v722_v48 = vsel %vm348_vm14, %v717_v47, -inf }
 0x46d   :  { %723 = vmax.xlane.f32.xlu0 %v722_v48 }
 0x481   :  { %904 = vrot.lane.b32.xlu0 %v2489_v30, %s2319_s0 }
 0x4a5   :  { %v721_v49 = vpop.xlane.xlu1 %720 }
 0x4a6   :  { %v725_v50 = vsub.f32 %v689_v42, %v721_v49  ;;  %v626_v42 = vpop.f32.mrf.mxu1 }
 0x4a7   :  { %v656_v45 = vadd.f32 %v2558_v55, %v626_v42  ;;  %v1006_v55 = vld [vmem:[#allocation10 + $0x38] sm:$0xff] }
 0x4a8   :  { %v727_v51 = vmul.f32 1.442695, %v725_v50  ;;  %v1990_v50 = vld [vmem:[%s2786_s11] ss:$0 sm:$0xff]  ;;  %1107 = vmatpush.msra.mxu1 %v1006_v55 }
 0x4aa   :  { %2023 = vpow2.f32 %v727_v51 }
 0x4b0   :  { %v2024_v52 = vpop.eup %2023 }
 0x4b1   :  { %v731_v53 = vsel %vm348_vm14, %v2024_v52, 0.0 }
 0x4b2   :  { %732 = vadd.xlane.f32.xlu2 %v731_v53 }
 0x4ca   :  { %741 = vrot.lane.b32.xlu2 %v2489_v30, %s2318_s29  ;;  %v882_v30 = vsel %vm348_vm14, %v852_v1, -inf }
 0x4df   :  { %v629_v43 = vpop.f32.mrf.mxu1 }
 0x4e0   :  { %v724_v57 = vpop.xlane.xlu0 %723 }
 0x4e1   :  { %v726_v59 = vsub.f32 %v717_v47, %v724_v57  ;;  %v1001_v57 = vld [vmem:[#allocation8 + $0x38] sm:$0xff] }
 0x4e3   :  { %v729_v60 = vmul.f32 1.442695, %v726_v59  ;;  %v1011_v59 = vld [vmem:[#allocation11 + $0x38] sm:$0xff] }
 0x4e5   :  { %2025 = vpow2.f32 %v729_v60  ;;  %v1000_v60 = vld [vmem:[#allocation8 + $0x30] sm:$0xff] }
 0x4eb   :  { %v2026_v61 = vpop.eup %2025 }
 0x4ec   :  { %v734_v0 = vsel %vm348_vm14, %v2026_v61, 0.0 }
 0x4ed   :  { %735 = vadd.xlane.f32.xlu1 %v734_v0  ;;  %v1004_v0 = vld [vmem:[#allocation10 + $0x28] sm:$0xff] }
 0x4f3   :  { %883 = vmax.xlane.f32.xlu2 %v882_v30  ;;  %v905_v22 = vpop.permute.xlu0 %904  ;;  %v998_v30 = vld [vmem:[#allocation8 + $0x20] sm:$0xff] }
 0x525   :  { %v733_v2 = vpop.xlane.xlu2 %732 }
 0x526   :  { %2027 = vrcp.f32 %v733_v2  ;;  %v1003_v2 = vld [vmem:[#allocation10 + $0x20] sm:$0xff] }
 0x52c   :  { %v2028_v3 = vpop.eup %2027 }
 0x52d   :  { %v739_v4 = vmul.f32 %v2028_v3, %v2024_v52  ;;  %v742_v5 = vpop.permute.xlu2 %741  ;;  %v1008_v3 = vld [vmem:[#allocation11 + $0x20] sm:$0xff] }
 0x52e   :  { %762 = vmatpush.msrb.mxu3 %v742_v5 }
 0x52f   :  { %1911 = vmatmul.msk.f32.vlgmr.msrb.gmra.mxu3 %vm348_vm14, %v739_v4 }
 0x530   :  { %1917 = vmatpush.xpose.msk.msra.mxu3 %vm348_vm14, %v857_v54 }
 0x534   :  { %977 = vmatpush.msrb.mxu3 %v218_v31 }
 0x537   :  { %1918 = vmatmul.msk.f32.vlgmr.msra.gmra.mxu3 %vm348_vm14, %v855_v56 }
 0x560   :  { %v736_v17 = vpop.xlane.xlu1 %735 }
 0x566   :  { %v884_v6 = vpop.xlane.xlu2 %883 }
 0x567   :  { %v888_v7 = vsub.f32 %v852_v1, %v884_v6  ;;  %v1009_v1 = vld [vmem:[#allocation11 + $0x28] sm:$0xff] }
 0x569   :  { %v890_v8 = vmul.f32 1.442695, %v888_v7 }
 0x56b   :  { %2029 = vpow2.f32 %v890_v8 }
 0x56c   :  { %2031 = vrcp.f32 %v736_v17 }
 0x571   :  { %v2030_v9 = vpop.eup %2029 }
 0x572   :  { %v894_v10 = vsel %vm348_vm14, %v2030_v9, 0.0  ;;  %v2032_v19 = vpop.eup %2031 }
 0x573   :  { %895 = vadd.xlane.f32.xlu1 %v894_v10  ;;  %v740_v20 = vmul.f32 %v2032_v19, %v2026_v61  ;;  %v1005_v61 = vld [vmem:[#allocation10 + $0x30] sm:$0xff]  ;;  %v659_v19 = vadd.f32 %v2560_v58, %v629_v43  ;;  %v1993_v58 = vld [vmem:[%s2782_s7 + $0x1] ss:$0 sm:$0xff] }
 0x574   :  { %1108 = vmatpush.msra.mxu1 %v1005_v61 }
 0x576   :  { %1109 = vmatpush.msra.mxu1 %v1004_v0 }
 0x578   :  { %1110 = vmatpush.msra.mxu1 %v1003_v2 }
 0x58c   :  { %767 = vrot.lane.b32.xlu1 %v2492_v33, %s2318_s29 }
 0x5b2   :  { %v764_v13 = vpop.f32.mrf.mxu3 }
 0x5b3   :  { %1913 = vmatmul.msk.f32.vlgmr.msrb.gmra.mxu1 %vm348_vm14, %v764_v13 }
 0x5ba   :  { %v879_v14 = vpop.f32.mrf.mxu3 }
 0x5bb   :  { %v880_v15 = vadd.f32 %v879_v14, %v2562_v62  ;;  %v1991_v14 = vld [vmem:[%s2778_s3 + $0x1] ss:$0 sm:$0xff] }
 0x5bd   :  { %v885_v16 = vsel %vm348_vm14, %v880_v15, -inf }
 0x5be   :  { %886 = vmax.xlane.f32.xlu2 %v885_v16 }
 0x5d6   :  { %930 = vrot.lane.b32.xlu2 %v2492_v33, %s2319_s0 }
 0x5e6   :  { %v896_v18 = vpop.xlane.xlu1 %895 }
 0x5e7   :  { %2033 = vrcp.f32 %v896_v18 }
 0x5ed   :  { %v2034_v23 = vpop.eup %2033 }
 0x5ee   :  { %v902_v24 = vmul.f32 %v2034_v23, %v2030_v9 }
 0x5fe   :  { %v768_v21 = vpop.permute.xlu1 %767 }
 0x5ff   :  { %788 = vmatpush.msra.mxu0 %v768_v21 }
 0x600   :  { %1912 = vmatmul.msk.f32.vlgmr.msra.gmra.mxu0 %vm348_vm14, %v740_v20 }
 0x601   :  { %925 = vmatpush.msrb.mxu0 %v905_v22 }
 0x603   :  { %1079 = vmatpush.msra.mxu0 %v1001_v57 }
 0x605   :  { %1080 = vmatpush.msra.mxu0 %v1000_v60 }
 0x607   :  { %1081 = vmatpush.msra.mxu0 %v999_v63 }
 0x608   :  { %1919 = vmatmul.msk.f32.vlgmr.msrb.gmra.mxu0 %vm348_vm14, %v902_v24 }
 0x609   :  { %1082 = vmatpush.msra.mxu0 %v998_v30 }
 0x630   :  { %v816_v44 = vpop.f32.mrf.mxu1 }
 0x631   :  { %v887_v25 = vpop.xlane.xlu2 %886  ;;  %v822_v47 = vadd.f32 %v816_v44, %v656_v45 }
 0x632   :  { %v889_v26 = vsub.f32 %v880_v15, %v887_v25 }
 0x634   :  { %v892_v27 = vmul.f32 1.442695, %v889_v26 }
 0x636   :  { %2035 = vpow2.f32 %v892_v27  ;;  %v1992_v27 = vld [vmem:[%s2780_s5 + $0x1] ss:$0 sm:$0xff] }
 0x639   :  { %v931_v33 = vpop.permute.xlu2 %930 }
 0x63a   :  { %951 = vmatpush.msrb.mxu2 %v931_v33 }
 0x63c   :  { %v2036_v28 = vpop.eup %2035  ;;  %1135 = vmatpush.msra.mxu2 %v1011_v59 }
 0x63d   :  { %v897_v29 = vsel %vm348_vm14, %v2036_v28, 0.0 }
 0x63e   :  { %898 = vadd.xlane.f32.xlu1 %v897_v29 }
 0x67d   :  { %v790_v34 = vpop.f32.mrf.mxu0 }
 0x67e   :  { %1914 = vmatmul.msk.f32.gmra.mxu1 %vm348_vm14, %v790_v34  ;;  %v1994_v34 = vld [vmem:[%s2784_s9 + $0x1] ss:$0 sm:$0xff]  ;;  %s2320_s9 = smov [#allocation15]  }
 0x685   :  { %v927_v35 = vpop.f32.mrf.mxu0 }
 0x686   :  { %1921 = vmatmul.msk.f32.vlgmr.msrb.gmra.mxu3 %vm348_vm14, %v927_v35 }
 0x6b1   :  { %v899_v36 = vpop.xlane.xlu1 %898 }
 0x6b2   :  { %2037 = vrcp.f32 %v899_v36 }
 0x6b8   :  { %v2038_v37 = vpop.eup %2037 }
 0x6b9   :  { %v903_v41 = vmul.f32 %v2038_v37, %v2036_v28 }
 0x6bb   :  { %1920 = vmatmul.msk.f32.vlgmr.msrb.gmra.mxu2 %vm348_vm14, %v903_v41 }
 0x6fb   :  { %v819_v18 = vpop.f32.mrf.mxu1 }
 0x6fc   :  { %v823_v20 = vadd.f32 %v819_v18, %v659_v19 }
 0x709   :  { %v979_v48 = vpop.f32.mrf.mxu3 }
 0x70a   :  { %v985_v49 = vadd.f32 %v979_v48, %v822_v47 }
 0x70c   :  { %v987_v51 = vadd.f32 %v985_v49, %v2437_v32  ;;  %v1010_v32 = vld [vmem:[#allocation11 + $0x30] sm:$0xff] }
 0x70d   :  { %1136 = vmatpush.msra.mxu2 %v1010_v32 }
 0x70e   :  { %v2589_v52 = vadd.f32 %v1990_v50, %v987_v51 }
 0x70f   :  { %1137 = vmatpush.msra.mxu2 %v1009_v1 }
 0x710   :  { %v1017_v53 = vmul.f32 %v2589_v52, %v2589_v52 }
 0x711   :  { %1138 = vmatpush.msra.mxu2 %v1008_v3 }
 0x712   :  { %v1019_v54 = vsel %vm157_vm0, %v1017_v53, 0.0 }
 0x713   :  { %1020 = vadd.xlane.f32.xlu0 %v1019_v54 }
 0x73e   :  { %v953_v56 = vpop.f32.mrf.mxu2 }
 0x73f   :  { %1922 = vmatmul.msk.f32.gmra.mxu3 %vm348_vm14, %v953_v56 }
 0x786   :  { %v1021_v4 = vpop.xlane.xlu0 %1020 }
 0x787   :  { %v1025_v5 = vmul.f32 %v1021_v4, %v2433_v12 }
 0x789   :  { %v1027_v6 = vadd.f32 1e-12, %v1025_v5 }
 0x78b   :  { %2039 = vrsqrt.f32 %v1027_v6  ;;  %vm1035_vm1 = vweird.f32 %v1027_v6 }
 0x791   :  { %v2040_v7 = vpop.eup %2039 }
 0x792   :  { %v1030_v8 = vmul.f32 %v2040_v7, %v1027_v6  ;;  %vm1036_vm15 = vweird.f32 %v2040_v7 }
 0x793   :  { %vm1037_vm2 = vmor %vm1035_vm1, %vm1036_vm15 }
 0x794   :  { %v1031_v9 = vmul.f32 %v2040_v7, %v1030_v8 }
 0x796   :  { %v1032_v10 = vmul.f32 0.5, %v1031_v9 }
 0x798   :  { %v1033_v11 = vsub.f32 1.5, %v1032_v10 }
 0x79a   :  { %v1034_v13 = vmul.f32 %v2040_v7, %v1033_v11 }
 0x79c   :  { %v1038_v15 = vsel %vm1037_vm2, %v2040_v7, %v1034_v13 }
 0x79d   :  { %v1049_v16 = vmul.f32 %v1038_v15, %v2589_v52 }
 0x79f   :  { %v1054_v17 = vmul.f32 %v1991_v14, %v1049_v16 }
 0x7a1   :  { %1925 = vmatmul.msk.f32.vlgmr.msra.gmra.mxu0 %vm157_vm0, %v1054_v17  ;;  %1928 = vmatmul.msk.f32.vlgmr.msra.gmra.mxu1 %vm157_vm0, %v1054_v17 }
 0x7a2   :  { %1931 = vmatmul.msk.f32.vlgmr.msra.gmra.mxu2 %vm157_vm0, %v1054_v17 }
 0x7c2   :  { %v982_v21 = vpop.f32.mrf.mxu3 }
 0x7c3   :  { %v986_v22 = vadd.f32 %v982_v21, %v823_v20 }
 0x7c5   :  { %v988_v23 = vadd.f32 %v986_v22, %v2442_v39 }
 0x7c7   :  { %v2605_v24 = vadd.f32 %v1990_v50, %v988_v23 }
 0x7c9   :  { %v1018_v25 = vmul.f32 %v2605_v24, %v2605_v24 }
 0x7cb   :  { %v1022_v26 = vsel %vm157_vm0, %v1018_v25, 0.0 }
 0x7cc   :  { %1023 = vadd.xlane.f32.xlu2 %v1022_v26 }
 0x81e   :  { %v1084_v33 = vpop.f32.mrf.mxu0  ;;  %v1112_v28 = vpop.f32.mrf.mxu1 }
 0x81f   :  { %v1085_v29 = vadd.f32 %v1992_v27, %v1084_v33  ;;  %v2616_v39 = vadd.f32 %v1993_v58, %v1112_v28 }
 0x821   :  { %v2618_v31 = vmul.f32 0.35355338, %v1085_v29  ;;  %1274 = vrot.lane.b32.xlu1 %v2616_v39, %s2317_s26  ;;  %1933 = vmatpush.xpose.msk.msra.mxu3 %vm348_vm14, %v2616_v39 }
 0x823   :  { %1272 = vrot.lane.b32.xlu0 %v2618_v31, %s2317_s26 }
 0x824   :  { %1934 = vmatmul.msk.f32.vlgmr.msra.gmra.mxu3 %vm348_vm14, %v2618_v31 }
 0x825   :  { %v1140_v35 = vpop.f32.mrf.mxu2 }
 0x826   :  { %v2631_v36 = vadd.f32 %v1994_v34, %v1140_v35 }
 0x828   :  { %1243 = vmatpush.msrb.mxu1 %v2631_v36 }
 0x83f   :  { %v1024_v37 = vpop.xlane.xlu2 %1023 }
 0x840   :  { %v1026_v41 = vmul.f32 %v1024_v37, %v2433_v12 }
 0x842   :  { %v1028_v42 = vadd.f32 1e-12, %v1026_v41 }
 0x844   :  { %2041 = vrsqrt.f32 %v1028_v42  ;;  %vm1045_vm4 = vweird.f32 %v1028_v42 }
 0x84a   :  { %v2042_v43 = vpop.eup %2041 }
 0x84b   :  { %v1040_v44 = vmul.f32 %v2042_v43, %v1028_v42  ;;  %vm1046_vm3 = vweird.f32 %v2042_v43 }
 0x84c   :  { %vm1047_vm5 = vmor %vm1045_vm4, %vm1046_vm3 }
 0x84d   :  { %v1041_v45 = vmul.f32 %v2042_v43, %v1040_v44 }
 0x84f   :  { %v1042_v47 = vmul.f32 0.5, %v1041_v45 }
 0x851   :  { %v1043_v48 = vsub.f32 1.5, %v1042_v47 }
 0x853   :  { %v1044_v49 = vmul.f32 %v2042_v43, %v1043_v48  ;;  %v1014_v48 = vld [vmem:[#allocation13 + $0x28] sm:$0xff] }
 0x855   :  { %v1048_v50 = vsel %vm1047_vm5, %v2042_v43, %v1044_v49 }
 0x856   :  { %v1050_v51 = vmul.f32 %v1048_v50, %v2605_v24 }
 0x858   :  { %v1055_v53 = vmul.f32 %v1991_v14, %v1050_v51 }
 0x85a   :  { %1926 = vmatmul.msk.f32.gmra.mxu0 %vm157_vm0, %v1055_v53  ;;  %1929 = vmatmul.msk.f32.gmra.mxu1 %vm157_vm0, %v1055_v53 }
 0x85b   :  { %1932 = vmatmul.msk.f32.gmra.mxu2 %vm157_vm0, %v1055_v53 }
 0x893   :  { %v1275_v54 = vpop.permute.xlu1 %1274 }
 0x894   :  { %1939 = vmatpush.xpose.msk.msrb.mxu3 %vm348_vm14, %v1275_v54 }
 0x895   :  { %v1273_v56 = vpop.permute.xlu0 %1272 }
 0x897   :  { %1940 = vmatmul.msk.f32.vlgmr.msrb.gmra.mxu3 %vm348_vm14, %v1273_v56 }
 0x898   :  { %1427 = vmatpush.msra.mxu3 %v1014_v48 }
 0x8a7   :  { %v1172_v55 = vpop.f32.mrf.mxu3 }
 0x8a8   :  { %v1173_v57 = vadd.f32 %v1172_v55, %v2499_v38 }
 0x8aa   :  { %v1201_v59 = vsel %vm348_vm14, %v1173_v57, -inf }
 0x8ab   :  { %1202 = vmax.xlane.f32.xlu1 %v1201_v59 }
 0x8c4   :  { %1353 = vrot.lane.b32.xlu1 %v2631_v36, %s2317_s26 }
 0x8cc   :  { %1465 = vrot.lane.b32.xlu1 %v2618_v31, %s2318_s29 }
 0x8d7   :  { %v1087_v60 = vpop.f32.mrf.mxu0  ;;  %v1115_v61 = vpop.f32.mrf.mxu1 }
 0x8d8   :  { %v1088_v32 = vadd.f32 %v1992_v27, %v1087_v60  ;;  %v1116_v63 = vadd.f32 %v1993_v58, %v1115_v61 }
 0x8da   :  { %v2647_v0 = vmul.f32 0.35355338, %v1088_v32  ;;  %1302 = vrot.lane.b32.xlu0 %v1116_v63, %s2317_s26  ;;  %1935 = vmatpush.xpose.msk.msrb.mxu0 %vm348_vm14, %v1116_v63 }
 0x8dd   :  { %1936 = vmatmul.msk.f32.vlgmr.msrb.gmra.mxu0 %vm348_vm14, %v2647_v0 }
 0x8de   :  { %v1143_v1 = vpop.f32.mrf.mxu2 }
 0x8df   :  { %v2653_v30 = vadd.f32 %v1994_v34, %v1143_v1 }
 0x8e1   :  { %1266 = vmatpush.msrb.mxu2 %v2653_v30 }
 0x91a   :  { %v1297_v2 = vpop.f32.mrf.mxu3 }
 0x91b   :  { %v1298_v3 = vadd.f32 %v1297_v2, %v2507_v46 }
 0x91d   :  { %v1328_v4 = vsel %vm348_vm14, %v1298_v3, -inf }
 0x91e   :  { %v1203_v5 = vpop.xlane.xlu1 %1202  ;;  %1329 = vmax.xlane.f32.xlu2 %v1328_v4 }
 0x91f   :  { %v1207_v6 = vsub.f32 %v1173_v57, %v1203_v5 }
 0x921   :  { %v1209_v7 = vmul.f32 1.442695, %v1207_v6 }
 0x923   :  { %2043 = vpow2.f32 %v1209_v7 }
 0x929   :  { %v2044_v8 = vpop.eup %2043 }
 0x92a   :  { %v1213_v9 = vsel %vm348_vm14, %v2044_v8, 0.0 }
 0x92b   :  { %1214 = vadd.xlane.f32.xlu0 %v1213_v9 }
 0x936   :  { %v1354_v10 = vpop.permute.xlu1 %1353  ;;  %1300 = vrot.lane.b32.xlu2 %v2647_v0, %s2317_s26 }
 0x937   :  { %1374 = vmatpush.msra.mxu1 %v1354_v10 }
 0x93e   :  { %v1466_v26 = vpop.permute.xlu1 %1465 }
 0x93f   :  { %1467 = vrot.lane.b32.xlu0 %v2616_v39, %s2318_s29 }
 0x94c   :  { %v1303_v11 = vpop.permute.xlu0 %1302 }
 0x94d   :  { %1941 = vmatpush.xpose.msk.msra.mxu0 %vm348_vm14, %v1303_v11 }
 0x95a   :  { %v1198_v13 = vpop.f32.mrf.mxu0 }
 0x95b   :  { %v1199_v14 = vadd.f32 %v1198_v13, %v2499_v38 }
 0x95d   :  { %v1204_v15 = vsel %vm348_vm14, %v1199_v14, -inf }
 0x95e   :  { %1205 = vmax.xlane.f32.xlu1 %v1204_v15 }
 0x977   :  { %1495 = vrot.lane.b32.xlu1 %v1116_v63, %s2318_s29 }
 0x97f   :  { %1629 = vrot.lane.b32.xlu1 %v2618_v31, %s2319_s0  ;;  %v1013_v31 = vld [vmem:[#allocation13 + $0x20] sm:$0xff] }
 0x980   :  { %1456 = vmatpush.msrb.mxu0 %v1013_v31 }
 0x987   :  { %1659 = vrot.lane.b32.xlu1 %v1116_v63, %s2319_s0 }
 0x991   :  { %v1330_v16 = vpop.xlane.xlu2 %1329 }
 0x992   :  { %v1334_v17 = vsub.f32 %v1298_v3, %v1330_v16 }
 0x994   :  { %v1336_v18 = vmul.f32 1.442695, %v1334_v17 }
 0x996   :  { %2045 = vpow2.f32 %v1336_v18 }
 0x999   :  { %v1301_v19 = vpop.permute.xlu2 %1300 }
 0x99a   :  { %1942 = vmatmul.msk.f32.vlgmr.msra.gmra.mxu0 %vm348_vm14, %v1301_v19 }
 0x99c   :  { %v2046_v20 = vpop.eup %2045 }
 0x99d   :  { %v1340_v38 = vsel %vm348_vm14, %v2046_v20, 0.0 }
 0x99e   :  { %v1215_v21 = vpop.xlane.xlu0 %1214  ;;  %1341 = vadd.xlane.f32.xlu2 %v1340_v38 }
 0x99f   :  { %2047 = vrcp.f32 %v1215_v21 }
 0x9a5   :  { %v2048_v22 = vpop.eup %2047 }
 0x9a6   :  { %v2672_v23 = vmul.f32 %v2048_v22, %v2044_v8 }
 0x9a8   :  { %1937 = vmatmul.msk.f32.vlgmr.msrb.gmra.mxu1 %vm348_vm14, %v2672_v23 }
 0x9b1   :  { %v1468_v25 = vpop.permute.xlu0 %1467 }
 0x9b2   :  { %1949 = vmatpush.xpose.msk.msrb.mxu1 %vm348_vm14, %v1468_v25 }
 0x9d1   :  { %v1206_v27 = vpop.xlane.xlu1 %1205 }
 0x9d2   :  { %v1208_v58 = vsub.f32 %v1199_v14, %v1206_v27 }
 0x9d4   :  { %v1211_v33 = vmul.f32 1.442695, %v1208_v58 }
 0x9d6   :  { %2049 = vpow2.f32 %v1211_v33  ;;  %v1015_v33 = vld [vmem:[#allocation13 + $0x30] sm:$0xff] }
 0x9d7   :  { %1618 = vmatpush.msrb.mxu3 %v1015_v33 }
 0x9dc   :  { %v2050_v28 = vpop.eup %2049 }
 0x9dd   :  { %v1216_v29 = vsel %vm348_vm14, %v2050_v28, 0.0 }
 0x9de   :  { %1217 = vadd.xlane.f32.xlu2 %v1216_v29 }
 0x9e9   :  { %v1496_v51 = vpop.permute.xlu1 %1495 }
 0x9f1   :  { %v1630_v60 = vpop.permute.xlu1 %1629 }
 0xa11   :  { %v1342_v34 = vpop.xlane.xlu2 %1341 }
 0xa12   :  { %2051 = vrcp.f32 %v1342_v34 }
 0xa17   :  { %v1325_v35 = vpop.f32.mrf.mxu0 }
 0xa18   :  { %v2052_v37 = vpop.eup %2051  ;;  %v1326_v41 = vadd.f32 %v1325_v35, %v2507_v46 }
 0xa19   :  { %v2679_v42 = vmul.f32 %v2052_v37, %v2046_v20 }
 0xa1a   :  { %v1331_v43 = vsel %vm348_vm14, %v1326_v41, -inf }
 0xa1b   :  { %1332 = vmax.xlane.f32.xlu0 %v1331_v43  ;;  %1943 = vmatmul.msk.f32.vlgmr.msra.gmra.mxu1 %vm348_vm14, %v2679_v42  ;;  %v1350_v19 = vadd.f32 %v2679_v42, %v2672_v23 }
 0xa23   :  { %1950 = vmatmul.msk.f32.vlgmr.msrb.gmra.mxu1 %vm348_vm14, %v1466_v26 }
 0xa25   :  { %v1245_v44 = vpop.f32.mrf.mxu1 }
 0xa26   :  { %1947 = vmatmul.msk.f32.vlgmr.msrb.gmra.mxu0 %vm348_vm14, %v1245_v44 }
 0xa2f   :  { %1493 = vrot.lane.b32.xlu0 %v2647_v0, %s2318_s29 }
 0xa37   :  { %1631 = vrot.lane.b32.xlu0 %v2616_v39, %s2319_s0 }
 0xa3f   :  { %1545 = vrot.lane.b32.xlu0 %v2631_v36, %s2318_s29 }
 0xa47   :  { %1657 = vrot.lane.b32.xlu0 %v2647_v0, %s2319_s0  ;;  %v1660_v0 = vpop.permute.xlu1 %1659 }
 0xa51   :  { %v1218_v46 = vpop.xlane.xlu2 %1217 }
 0xa52   :  { %2053 = vrcp.f32 %v1218_v46 }
 0xa58   :  { %v2054_v45 = vpop.eup %2053 }
 0xa59   :  { %v2694_v47 = vmul.f32 %v2054_v45, %v2050_v28 }
 0xa5b   :  { %1938 = vmatmul.msk.f32.vlgmr.msrb.gmra.mxu2 %vm348_vm14, %v2694_v47 }
 0xa8e   :  { %v1333_v49 = vpop.xlane.xlu0 %1332 }
 0xa8f   :  { %v1335_v39 = vsub.f32 %v1326_v41, %v1333_v49 }
 0xa91   :  { %v1338_v53 = vmul.f32 1.442695, %v1335_v39 }
 0xa93   :  { %2055 = vpow2.f32 %v1338_v53 }
 0xa98   :  { %v1376_v50 = vpop.f32.mrf.mxu1 }
 0xa99   :  { %1945 = vmatmul.msk.f32.vlgmr.msra.gmra.mxu3 %vm348_vm14, %v1376_v50  ;;  %v2056_v59 = vpop.eup %2055 }
 0xa9a   :  { %v1343_v32 = vsel %vm348_vm14, %v2056_v59, 0.0 }
 0xaa0   :  { %v1490_v54 = vpop.f32.mrf.mxu1 }
 0xaa1   :  { %v1491_v56 = vadd.f32 %v1490_v54, %v2546_v40  ;;  %v1494_v55 = vpop.permute.xlu0 %1493 }
 0xaa3   :  { %v1521_v57 = vsel %vm348_vm14, %v1491_v56, -inf  ;;  %v2715_v11 = vpop.f32.mrf.mxu0 }
 0xaa4   :  { %1522 = vmax.xlane.f32.xlu2 %v1521_v57 }
 0xaa9   :  { %v1632_v61 = vpop.permute.xlu0 %1631 }
 0xaaa   :  { %1957 = vmatpush.xpose.msk.msra.mxu0 %vm348_vm14, %v1632_v61 }
 0xaac   :  { %1344 = vadd.xlane.f32.xlu2 %v1343_v32 }
 0xab1   :  { %v1546_v63 = vpop.permute.xlu0 %1545 }
 0xab2   :  { %1566 = vmatpush.msra.mxu1 %v1546_v63  ;;  %v1016_v63 = vld [vmem:[#allocation13 + $0x38] sm:$0xff] }
 0xab4   :  { %1959 = vmatpush.xpose.msk.msrb.mxu1 %vm348_vm14, %v1660_v0 }
 0xab9   :  { %v1658_v21 = vpop.permute.xlu0 %1657 }
 0xac4   :  { %1380 = vrot.lane.b32.xlu2 %v2653_v30, %s2317_s26 }
 0xade   :  { %v1268_v1 = vpop.f32.mrf.mxu2 }
 0xadf   :  { %1948 = vmatmul.msk.f32.gmra.mxu0 %vm348_vm14, %v1268_v1 }
 0xae7   :  { %1958 = vmatmul.msk.f32.vlgmr.msra.gmra.mxu0 %vm348_vm14, %v1630_v60 }
 0xb17   :  { %v1523_v2 = vpop.xlane.xlu2 %1522 }
 0xb18   :  { %v1527_v3 = vsub.f32 %v1491_v56, %v1523_v2 }
 0xb1a   :  { %v1529_v4 = vmul.f32 1.442695, %v1527_v3 }
 0xb1c   :  { %2057 = vpow2.f32 %v1529_v4 }
 0xb1f   :  { %v1345_v5 = vpop.xlane.xlu2 %1344 }
 0xb20   :  { %2059 = vrcp.f32 %v1345_v5  ;;  %v1429_v5 = vpop.f32.mrf.mxu3 }
 0xb22   :  { %v2058_v6 = vpop.eup %2057 }
 0xb23   :  { %v1533_v7 = vsel %vm348_vm14, %v2058_v6, 0.0 }
 0xb24   :  { %1534 = vadd.xlane.f32.xlu2 %v1533_v7 }
 0xb26   :  { %v2060_v8 = vpop.eup %2059 }
 0xb27   :  { %v2709_v9 = vmul.f32 %v2060_v8, %v2056_v59  ;;  %v1381_v10 = vpop.permute.xlu2 %1380  ;;  %v1459_v8 = vadd.f32 %v2715_v11, %v1429_v5 }
 0xb28   :  { %1401 = vmatpush.msra.mxu2 %v1381_v10 }
 0xb29   :  { %1944 = vmatmul.msk.f32.vlgmr.msra.gmra.mxu2 %vm348_vm14, %v2709_v9  ;;  %v1351_v54 = vadd.f32 %v2709_v9, %v2694_v47 }
 0xb2a   :  { %1951 = vmatpush.xpose.msk.msrb.mxu2 %vm348_vm14, %v1496_v51 }
 0xb31   :  { %1952 = vmatmul.msk.f32.vlgmr.msrb.gmra.mxu2 %vm348_vm14, %v1494_v55 }
 0xb5c   :  { %v2717_v13 = vpop.f32.mrf.mxu0 }
 0xb64   :  { %v1654_v14 = vpop.f32.mrf.mxu0 }
 0xb65   :  { %v1655_v15 = vadd.f32 %v1654_v14, %v2562_v62 }
 0xb67   :  { %v1685_v16 = vsel %vm348_vm14, %v1655_v15, -inf }
 0xb68   :  { %1686 = vmax.xlane.f32.xlu2 %v1685_v16 }
 0xb80   :  { %1571 = vrot.lane.b32.xlu2 %v2653_v30, %s2318_s29 }
 0xb97   :  { %v1535_v17 = vpop.xlane.xlu2 %1534 }
 0xb98   :  { %2061 = vrcp.f32 %v1535_v17 }
 0xb9e   :  { %v2062_v18 = vpop.eup %2061 }
 0xb9f   :  { %v1541_v20 = vmul.f32 %v2062_v18, %v2058_v6 }
 0xba1   :  { %v1543_v38 = vadd.f32 %v1541_v20, %v1350_v19  ;;  %1953 = vmatmul.msk.f32.vlgmr.msra.gmra.mxu1 %vm348_vm14, %v1541_v20 }
 0xba2   :  { %1782 = vmatpush.msra.mxu1 %v1016_v63 }
 0xba9   :  { %1960 = vmatmul.msk.f32.vlgmr.msrb.gmra.mxu1 %vm348_vm14, %v1658_v21 }
 0xbac   :  { %v1403_v22 = vpop.f32.mrf.mxu2 }
 0xbad   :  { %1946 = vmatmul.msk.f32.gmra.mxu3 %vm348_vm14, %v1403_v22 }
 0xbb4   :  { %v1518_v25 = vpop.f32.mrf.mxu2 }
 0xbb5   :  { %v1519_v26 = vadd.f32 %v1518_v25, %v2546_v40 }
 0xbb7   :  { %v1524_v27 = vsel %vm348_vm14, %v1519_v26, -inf }
 0xbb8   :  { %1525 = vmax.xlane.f32.xlu1 %v1524_v27 }
 0xbd1   :  { %1709 = vrot.lane.b32.xlu1 %v2631_v36, %s2319_s0 }
 0xbdb   :  { %v1687_v23 = vpop.xlane.xlu2 %1686 }
 0xbdc   :  { %v1691_v37 = vsub.f32 %v1655_v15, %v1687_v23  ;;  %v1995_v15 = vld [vmem:[%s2786_s11 + $0x1] ss:$0 sm:$0xff]  ;;  %s1862_s11 = sshll.u32 %s2320_s9, 4  ;;  %s1863_s11 = int_to_ptr.vmem [resolvable:$true] %s1862_s11 }
 0xbde   :  { %v1693_v36 = vmul.f32 1.442695, %v1691_v37 }
 0xbe3   :  { %v1572_v58 = vpop.permute.xlu2 %1571 }
 0xbe4   :  { %1592 = vmatpush.msra.mxu2 %v1572_v58 }
 0xc1e   :  { %v1568_v28 = vpop.f32.mrf.mxu1 }
 0xc1f   :  { %1955 = vmatmul.msk.f32.vlgmr.msrb.gmra.mxu3 %vm348_vm14, %v1568_v28 }
 0xc26   :  { %v1682_v29 = vpop.f32.mrf.mxu1 }
 0xc27   :  { %v1683_v31 = vadd.f32 %v1682_v29, %v2562_v62 }
 0xc29   :  { %v1688_v34 = vsel %vm348_vm14, %v1683_v31, -inf }
 0xc2a   :  { %1689 = vmax.xlane.f32.xlu0 %v1688_v34 }
 0xc2b   :  { %v1526_v40 = vpop.xlane.xlu1 %1525 }
 0xc2c   :  { %v1528_v35 = vsub.f32 %v1519_v26, %v1526_v40  ;;  %v1996_v40 = vld [vmem:[#allocation5] ss:$0 sm:$0xff] }
 0xc2e   :  { %v1531_v41 = vmul.f32 1.442695, %v1528_v35 }
 0xc30   :  { %2063 = vpow2.f32 %v1531_v41  ;;  %v1432_v6 = vpop.f32.mrf.mxu3 }
 0xc31   :  { %2065 = vpow2.f32 %v1693_v36 }
 0xc36   :  { %v2064_v42 = vpop.eup %2063 }
 0xc37   :  { %v1536_v43 = vsel %vm348_vm14, %v2064_v42, 0.0  ;;  %v2066_v44 = vpop.eup %2065 }
 0xc38   :  { %1537 = vadd.xlane.f32.xlu2 %v1536_v43  ;;  %v1697_v46 = vsel %vm348_vm14, %v2066_v44, 0.0 }
 0xc40   :  { %1698 = vadd.xlane.f32.xlu2 %v1697_v46 }
 0xc43   :  { %v1710_v45 = vpop.permute.xlu1 %1709 }
 0xc44   :  { %1730 = vmatpush.msrb.mxu2 %v1710_v45 }
 0xc58   :  { %1735 = vrot.lane.b32.xlu2 %v2653_v30, %s2319_s0 }
 0xc9d   :  { %v1690_v62 = vpop.xlane.xlu0 %1689 }
 0xc9e   :  { %v1692_v48 = vsub.f32 %v1683_v31, %v1690_v62 }
 0xca0   :  { %v1695_v49 = vmul.f32 1.442695, %v1692_v48 }
 0xca2   :  { %2067 = vpow2.f32 %v1695_v49  ;;  %v1620_v7 = vpop.f32.mrf.mxu3 }
 0xca3   :  { %v1626_v9 = vadd.f32 %v1620_v7, %v1459_v8 }
 0xca8   :  { %v2068_v50 = vpop.eup %2067 }
 0xca9   :  { %v1700_v39 = vsel %vm348_vm14, %v2068_v50, 0.0 }
 0xcaa   :  { %1701 = vadd.xlane.f32.xlu0 %v1700_v39 }
 0xcab   :  { %v1538_v51 = vpop.xlane.xlu2 %1537 }
 0xcac   :  { %2069 = vrcp.f32 %v1538_v51 }
 0xcb2   :  { %v2070_v53 = vpop.eup %2069 }
 0xcb3   :  { %v1542_v56 = vmul.f32 %v2070_v53, %v2064_v42  ;;  %v1699_v55 = vpop.xlane.xlu2 %1698 }
 0xcb4   :  { %2071 = vrcp.f32 %v1699_v55 }
 0xcb5   :  { %v1544_v57 = vadd.f32 %v1542_v56, %v1351_v54  ;;  %1954 = vmatmul.msk.f32.vlgmr.msra.gmra.mxu2 %vm348_vm14, %v1542_v56 }
 0xcba   :  { %v2072_v30 = vpop.eup %2071 }
 0xcbb   :  { %v1705_v59 = vmul.f32 %v2072_v30, %v2066_v44  ;;  %v1736_v60 = vpop.permute.xlu2 %1735 }
 0xcbc   :  { %1756 = vmatpush.msrb.mxu0 %v1736_v60 }
 0xcbd   :  { %v1707_v61 = vadd.f32 %v1705_v59, %v1543_v38  ;;  %1961 = vmatmul.msk.f32.vlgmr.msrb.gmra.mxu2 %vm348_vm14, %v1705_v59  ;;  %v1462_v38 = vadd.f32 %v2717_v13, %v1432_v6 }
 0xcbf   :  { %1843 = vst.msk [vmem:[#allocation15] sm:$0xff] %vm348_vm14, %v1707_v61 }
 0xd1d   :  { %v1702_v32 = vpop.xlane.xlu0 %1701 }
 0xd1e   :  { %2073 = vrcp.f32 %v1702_v32 }
 0xd24   :  { %v2074_v47 = vpop.eup %2073 }
 0xd25   :  { %v1706_v0 = vmul.f32 %v2074_v47, %v2068_v50 }
 0xd27   :  { %v1708_v1 = vadd.f32 %v1706_v0, %v1544_v57  ;;  %1962 = vmatmul.msk.f32.vlgmr.msrb.gmra.mxu0 %vm348_vm14, %v1706_v0 }
 0xd29   :  { %1844 = vst.msk [vmem:[#allocation15 + $0x8] sm:$0xff] %vm348_vm14, %v1708_v1 }
 0xd2a   :  { %1870 = dma.vmem_to_hbm [thread:$0]  %s1863_s11, 256, %s1865_s10, [#allocation16], %s2309_s1, %s2309_s1, %s2310_s21  }
 0xd38   :  { %v1594_v2 = vpop.f32.mrf.mxu2 }
 0xd39   :  { %1956 = vmatmul.msk.f32.gmra.mxu3 %vm348_vm14, %v1594_v2 }
 0xd40   :  { %v1732_v3 = vpop.f32.mrf.mxu2 }
 0xd41   :  { %1963 = vmatmul.msk.f32.vlgmr.msra.gmra.mxu1 %vm348_vm14, %v1732_v3 }
 0xda4   :  { %v1758_v4 = vpop.f32.mrf.mxu0 }
 0xda5   :  { %1964 = vmatmul.msk.f32.gmra.mxu1 %vm348_vm14, %v1758_v4 }
 0xdbc   :  { %v1623_v20 = vpop.f32.mrf.mxu3 }
 0xdbd   :  { %v1627_v21 = vadd.f32 %v1623_v20, %v1462_v38 }
 0xdbe   :  { %v1784_v10 = vpop.f32.mrf.mxu1 }
 0xdbf   :  { %v1790_v14 = vadd.f32 %v1784_v10, %v1626_v9 }
 0xdc1   :  { %v1792_v16 = vadd.f32 %v1790_v14, %v2589_v52 }
 0xdc3   :  { %v1799_v17 = vadd.f32 %v1995_v15, %v1792_v16 }
 0xdc5   :  { %v1802_v18 = vmul.f32 %v1799_v17, %v1799_v17 }
 0xdc7   :  { %v1804_v19 = vsel %vm157_vm0, %v1802_v18, 0.0 }
 0xdc8   :  { %1805 = vadd.xlane.f32.xlu0 %v1804_v19 }
 0xe22   :  { %v1787_v22 = vpop.f32.mrf.mxu1 }
 0xe23   :  { %v1791_v11 = vadd.f32 %v1787_v22, %v1627_v21 }
 0xe25   :  { %v1793_v25 = vadd.f32 %v1791_v11, %v2605_v24 }
 0xe27   :  { %v1800_v26 = vadd.f32 %v1995_v15, %v1793_v25 }
 0xe29   :  { %v1803_v27 = vmul.f32 %v1800_v26, %v1800_v26 }
 0xe2b   :  { %v1807_v23 = vsel %vm157_vm0, %v1803_v27, 0.0 }
 0xe2c   :  { %1808 = vadd.xlane.f32.xlu2 %v1807_v23 }
 0xe3b   :  { %v1806_v58 = vpop.xlane.xlu0 %1805 }
 0xe3c   :  { %v1810_v52 = vmul.f32 %v1806_v58, %v2433_v12 }
 0xe3e   :  { %v1812_v13 = vadd.f32 1e-06, %v1810_v52 }
 0xe40   :  { %2075 = vrsqrt.f32 %v1812_v13  ;;  %vm1820_vm7 = vweird.f32 %v1812_v13 }
 0xe46   :  { %v2076_v24 = vpop.eup %2075 }
 0xe47   :  { %v1815_v33 = vmul.f32 %v2076_v24, %v1812_v13  ;;  %vm1821_vm6 = vweird.f32 %v2076_v24 }
 0xe48   :  { %vm1822_vm8 = vmor %vm1820_vm7, %vm1821_vm6 }
 0xe49   :  { %v1816_v28 = vmul.f32 %v2076_v24, %v1815_v33 }
 0xe4b   :  { %v1817_v29 = vmul.f32 0.5, %v1816_v28 }
 0xe4d   :  { %v1818_v31 = vsub.f32 1.5, %v1817_v29 }
 0xe4f   :  { %v1819_v34 = vmul.f32 %v2076_v24, %v1818_v31 }
 0xe51   :  { %v1823_v35 = vsel %vm1822_vm8, %v2076_v24, %v1819_v34 }
 0xe52   :  { %v1834_v37 = vmul.f32 %v1823_v35, %v1799_v17 }
 0xe54   :  { %v1839_v41 = vmul.f32 %v1996_v40, %v1834_v37 }
 0xe56   :  { %1841 = vst.msk [vmem:[#allocation14] sm:$0xff] %vm157_vm0, %v1839_v41 }
 0xe9f   :  { %v1809_v36 = vpop.xlane.xlu2 %1808 }
 0xea0   :  { %v1811_v42 = vmul.f32 %v1809_v36, %v2433_v12 }
 0xea2   :  { %v1813_v43 = vadd.f32 1e-06, %v1811_v42 }
 0xea4   :  { %2077 = vrsqrt.f32 %v1813_v43  ;;  %vm1830_vm10 = vweird.f32 %v1813_v43 }
 0xeaa   :  { %v2078_v44 = vpop.eup %2077 }
 0xeab   :  { %v1825_v46 = vmul.f32 %v2078_v44, %v1813_v43  ;;  %vm1831_vm9 = vweird.f32 %v2078_v44 }
 0xeac   :  { %vm1832_vm11 = vmor %vm1830_vm10, %vm1831_vm9 }
 0xead   :  { %v1826_v45 = vmul.f32 %v2078_v44, %v1825_v46 }
 0xeaf   :  { %v1827_v62 = vmul.f32 0.5, %v1826_v45 }
 0xeb1   :  { %v1828_v48 = vsub.f32 1.5, %v1827_v62 }
 0xeb3   :  { %v1829_v49 = vmul.f32 %v2078_v44, %v1828_v48 }
 0xeb5   :  { %v1833_v50 = vsel %vm1832_vm11, %v2078_v44, %v1829_v49 }
 0xeb6   :  { %v1835_v39 = vmul.f32 %v1833_v50, %v1800_v26 }
 0xeb8   :  { %v1840_v12 = vmul.f32 %v1996_v40, %v1835_v39 }
 0xeba   :  { %1842 = vst.msk [vmem:[#allocation14 + $0x8] sm:$0xff] %vm157_vm0, %v1840_v12 }
 0xebb   :  { %1857 = dma.vmem_to_hbm [thread:$0]  %s1850_s23, 256, %s1852_s25, [#allocation4], %s2309_s1, %s2309_s1, %s2310_s21  }
 0xebc   :  { %2303 = dma.done.wait [#allocation4], 256  }
 0xebd   :  { %2304 = vsyncadd [#allocation4], 4294967040 }
 0xebe   :  { %2305 = dma.done.wait [#allocation16], 256  }
 0xebf   :  { %2306 = vsyncadd [#allocation16], 4294967040 }
 0xec0   :  { %1879 = vsyncpa [#allocation3], 1 }
 0xec1   :  { %1880 = vsyncpa [#allocation6], 1 }
 0xec2   :  { %1881 = vsyncpa [#allocation9], 1 }
 0xec3   :  { %1882 = vsyncpa [#allocation12], 1 }
 0xec4   :  { %1883 = vsyncpa [#allocation4], 1 }
 0xec5   :  { %1884 = vsyncpa [#allocation16], 1 }

</bundles_post_ra>
